<compile_context>
chip_gen: v7x
topology: tpu7x:2x2x1
jax: 0.10.0
libtpu: 0.0.40
codegen_flags: <defaults>
</compile_context>

<pallas_src>
import jax
import jax.numpy as jnp
from jax import lax
from jax.experimental import pallas as pl
from jax.experimental.pallas import tpu as pltpu

N_FEAT = 8          # n_feat
KSIZE = 3           # kernel_size
N_RESBLOCKS = 2     # n_resblocks
RES_SCALE = 1.0     # res_scale
N_LAYERS = 2 * N_RESBLOCKS + 1   # 2 convs per LFFB + trailing conv


def glaffm_pallas(x, weights, biases):
    """x: (N, C, H, W) f32 NCHW; weights: (L, 3, 3, Cin, Cout) HWIO; biases: (L, C)."""
    N, C, H, W = x.shape
    L = weights.shape[0]

    Wp = W + 2                      # padded row width ("virtual" row stride)
    M2 = H * Wp                     # im2col M (includes 2 junk columns per row)
    LH = ((Wp + 1 + 127) // 128) * 128   # 128-aligned leading halo (>= Wp+1)
    TRAIL = Wp + 2                  # trailing halo (covers the +Wp+1 tap reach)
    PADLEN = LH + M2 + TRAIL        # flat spatial length of padded activations
    K_TAPS = KSIZE * KSIZE * C      # 72 real contraction rows
    KK = K_TAPS + 8                 # +1 bias row, +7 zero rows -> 8-aligned K

    # ---------------- wrapper-side layout plumbing (no compute) ----------------
    # x -> channel-major flat layout with zero junk columns and zero halos.
    xw = jnp.pad(x, ((0, 0), (0, 0), (0, 0), (0, 2)))        # (N, C, H, Wp)
    xflat = xw.reshape(N, C, M2)
    xp = jnp.pad(xflat, ((0, 0), (0, 0), (LH, TRAIL)))       # (N, C, PADLEN)

    # (L, 3, 3, Cin, Cout) -> (L, 9*Cin, Cout); append bias row + zero rows;
    # transpose so the matmul is  w_aug (Cout, KK) @ patches (KK, M2).
    w_flat = weights.reshape(L, K_TAPS, C)
    w_aug = jnp.concatenate(
        [w_flat, biases.reshape(L, 1, C),
         jnp.zeros((L, KK - K_TAPS - 1, C), w_flat.dtype)], axis=1)   # (L, KK, C)
    w_t = jnp.transpose(w_aug, (0, 2, 1)).astype(jnp.bfloat16)        # (L, C, KK)

    def kernel(x_ref, w_ref, o_ref, yb, tb, pb):
        # x_ref: (1, C, PADLEN)  padded input image (zeros in halos/junk cols)
        # w_ref: (L, C, KK)      bf16 im2col weights (+bias row, +zero rows)
        # o_ref: (1, C, M2)      body output in the flat "virtual" layout
        # yb/tb: (C, PADLEN)     running / temp activation, same layout
        # pb:    (KK, M2)        im2col patch matrix (taps on sublanes)
        f32 = jnp.float32

        # validity mask: 1.0 for the W real columns of each padded row.
        col = lax.broadcasted_iota(jnp.int32, (C, M2), 1) % Wp
        mask = (col < W).astype(f32)                                  # (C, M2)

        # Halo lanes of the scratch activations must be zero; the interior
        # window (and its junk columns) is fully rewritten below.
        zlead = jnp.zeros((C, LH), f32)
        ztail = jnp.zeros((C, TRAIL), f32)
        yb[:, 0:LH] = zlead
        tb[:, 0:LH] = zlead
        yb[:, LH + M2:] = ztail
        tb[:, LH + M2:] = ztail

        # Constant rows of the patch matrix: one "ones" row (bias) + 7 zero
        # rows, written once per image; tap rows are rewritten by every conv.
        crow = lax.broadcasted_iota(jnp.int32, (KK - K_TAPS, M2), 0)
        pb[K_TAPS:KK, :] = (crow == 0).astype(f32)

        def read_x(off):
            return x_ref[0, :, off:off + M2]

        def read_yb(off):
            return yb[:, off:off + M2]

        def read_tb(off):
            return tb[:, off:off + M2]

        def conv3x3(read, layer):
            # im2col: each tap is a contiguous lane window of the flat buffer;
            # the store into pb is sublane-aligned and full-lane-width.
            for ky in range(KSIZE):
                for kx in range(KSIZE):
                    t = ky * KSIZE + kx
                    off = LH + (ky - 1) * Wp + (kx - 1)
                    pb[t * C:(t + 1) * C, :] = read(off)
            patches = pb[...].astype(jnp.bfloat16)                    # (KK, M2)
            # One MXU matmul per conv; bias rides in via the ones row.
            return jnp.dot(w_ref[layer], patches,
                           preferred_element_type=jnp.float32)        # (C, M2) f32

        # ---- LFFB blocks: conv -> ReLU -> conv -> + residual ----
        for r in range(N_RESBLOCKS):
            src = read_x if r == 0 else read_yb
            v = jnp.maximum(conv3x3(src, 2 * r), 0.0)
            tb[:, LH:LH + M2] = mask * v                  # keep junk columns zero
            v = conv3x3(read_tb, 2 * r + 1)
            base = read_x(LH) if r == 0 else read_yb(LH)  # residual input
            yb[:, LH:LH + M2] = base + mask * v

        # TODO(synk): attention.GLA (LSH-based global/local attention) source was
        # not provided with the module; it is passed through as identity here.

        # trailing conv of the body, then out = body * res_scale + x.
        v = conv3x3(read_yb, 2 * N_RESBLOCKS)
        o_ref[0] = (v * RES_SCALE + read_x(LH)).astype(o_ref.dtype)

    out_virt = pl.pallas_call(
        kernel,
        out_shape=jax.ShapeDtypeStruct((N, C, M2), x.dtype),
        grid_spec=pltpu.PrefetchScalarGridSpec(
            num_scalar_prefetch=0,
            grid=(N,),
            in_specs=[
                pl.BlockSpec((1, C, PADLEN), lambda n: (n, 0, 0)),
                pl.BlockSpec((L, C, KK), lambda n: (0, 0, 0)),
            ],
            out_specs=pl.BlockSpec((1, C, M2), lambda n: (n, 0, 0)),
            scratch_shapes=[
                pltpu.VMEM((C, PADLEN), jnp.float32),   # yb (running activation)
                pltpu.VMEM((C, PADLEN), jnp.float32),   # tb (temp activation)
                pltpu.VMEM((KK, M2), jnp.float32),      # pb (im2col patches)
            ],
        ),
        compiler_params=pltpu.CompilerParams(
            dimension_semantics=("parallel",)),
    )(xp, w_t)

    # drop the 2 junk columns per padded row -> (N, C, H, W)
    return out_virt.reshape(N, C, H, Wp)[:, :, :, :W]


# ------------- pure-JAX reference (NCHW / HWIO, same semantics) -------------
# The kernel feeds the MXU bf16 operands with f32 accumulation, so the
# reference applies the same bf16 rounding to the conv inputs; everything
# else (ReLU, residuals, res_scale) is f32, exactly like the kernel.
def _round_bf16(a):
    return a.astype(jnp.bfloat16).astype(jnp.float32)


def _conv3x3_ref(x, w, b):
    y = lax.conv_general_dilated(
        _round_bf16(x), _round_bf16(w), window_strides=(1, 1), padding="SAME",
        dimension_numbers=("NCHW", "HWIO", "NCHW"),
        precision=lax.Precision.HIGHEST)
    return y + _round_bf16(b).reshape(1, -1, 1, 1)


def glaffm_ref(x, weights, biases):
    y = x
    for r in range(N_RESBLOCKS):
        t = _conv3x3_ref(y, weights[2 * r], biases[2 * r])
        t = jnp.maximum(t, 0.0)
        t = _conv3x3_ref(t, weights[2 * r + 1], biases[2 * r + 1])
        y = y + t
    # GLA: identity pass-through (see TODO in kernel)
    y = _conv3x3_ref(y, weights[2 * N_RESBLOCKS], biases[2 * N_RESBLOCKS])
    return y * RES_SCALE + x


if __name__ == "__main__":
    key = jax.random.PRNGKey(0)
    kx, kw, kb = jax.random.split(key, 3)

    N, C, H, W = 2, N_FEAT, 16, 16
    x = jax.random.normal(kx, (N, C, H, W), dtype=jnp.float32)

    fan_in = C * KSIZE * KSIZE
    weights = (jax.random.normal(kw, (N_LAYERS, KSIZE, KSIZE, C, C),
                                 dtype=jnp.float32) / jnp.sqrt(fan_in))
    biases = jax.random.normal(kb, (N_LAYERS, C), dtype=jnp.float32) * 0.01

    out = glaffm_pallas(x, weights, biases)
    jax.block_until_ready(out)

    ref = glaffm_ref(x, weights, biases)
    err = float(jnp.max(jnp.abs(out - ref)))
    if not (err < 1e-2):
        raise AssertionError(f"Pallas/JAX mismatch: max abs err = {err}")
    print("KERNEL_OK")
</pallas_src>

<mosaic_0001>
module attributes {stable_mosaic.version = 11 : i64} {
  func.func @kernel(%arg0: i32, %arg1: memref<1x8x436xf32, #tpu.memory_space<vmem>>, %arg2: memref<5x8x80xbf16, #tpu.memory_space<vmem>>, %arg3: memref<1x8x288xf32, #tpu.memory_space<vmem>>, %arg4: memref<8x436xf32, #tpu.memory_space<vmem>>, %arg5: memref<8x436xf32, #tpu.memory_space<vmem>>, %arg6: memref<80x288xf32, #tpu.memory_space<vmem>>) attributes {dimension_semantics = [#tpu.dimension_semantics<parallel>], iteration_bounds = array<i64: 2>, scalar_prefetch = 0 : i64, scratch_operands = 3 : i64, tpu.core_type = #tpu.core_type<tc>, window_params = [{transform_indices = @transform_0, window_bounds = array<i64: 1, 8, 436>}, {pipeline_mode = #tpu.pipeline_mode<synchronous>, transform_indices = @transform_1, window_bounds = array<i64: 5, 8, 80>}, {transform_indices = @transform_2, window_bounds = array<i64: 1, 8, 288>}]} {
    %0 = tpu.iota {dimensions = array<i32: 1>} : vector<8x288xi32>
    %c18_i32 = arith.constant 18 : i32
    %c0_i32 = arith.constant 0 : i32
    %1 = arith.cmpi eq, %c18_i32, %c0_i32 : i32
    %c1_i32 = arith.constant 1 : i32
    %2 = arith.select %1, %c1_i32, %c18_i32 : i32
    %3 = vector.broadcast %2 : i32 to vector<8x288xi32>
    %4 = arith.remsi %0, %3 : vector<8x288xi32>
    %c0_i32_0 = arith.constant 0 : i32
    %5 = vector.broadcast %c0_i32_0 : i32 to vector<8x288xi32>
    %6 = arith.cmpi ne, %4, %5 : vector<8x288xi32>
    %c0_i32_1 = arith.constant 0 : i32
    %7 = vector.broadcast %c0_i32_1 : i32 to vector<8x288xi32>
    %8 = arith.cmpi slt, %4, %7 : vector<8x288xi32>
    %c0_i32_2 = arith.constant 0 : i32
    %9 = arith.cmpi slt, %2, %c0_i32_2 : i32
    %10 = vector.broadcast %9 : i1 to vector<8x288xi1>
    %11 = vector.broadcast %10 : vector<8x288xi1> to vector<8x288xi1>
    %12 = arith.xori %8, %11 : vector<8x288xi1>
    %13 = arith.andi %12, %6 : vector<8x288xi1>
    %14 = vector.broadcast %2 : i32 to vector<8x288xi32>
    %15 = arith.addi %4, %14 : vector<8x288xi32>
    %16 = arith.select %13, %15, %4 : vector<8x288xi1>, vector<8x288xi32>
    %c16_i32 = arith.constant 16 : i32
    %17 = vector.broadcast %c16_i32 : i32 to vector<8x288xi32>
    %18 = arith.cmpi slt, %16, %17 : vector<8x288xi32>
    %19 = arith.extui %18 : vector<8x288xi1> to vector<8x288xi32>
    %20 = arith.sitofp %19 : vector<8x288xi32> to vector<8x288xf32>
    %cst = arith.constant 0.000000e+00 : f32
    %21 = vector.broadcast %cst : f32 to vector<8x128xf32>
    %cst_3 = arith.constant 0.000000e+00 : f32
    %22 = vector.broadcast %cst_3 : f32 to vector<8x20xf32>
    %c0 = arith.constant 0 : index
    %c0_4 = arith.constant 0 : index
    %23 = vector.load %arg4[%c0, %c0_4] : memref<8x436xf32, #tpu.memory_space<vmem>>, vector<8x128xf32>
    tpu.vector_store %arg4[%c0, %c0_4], %21 {strides = array<i32>} : memref<8x436xf32, #tpu.memory_space<vmem>>, vector<8x128xf32>,
    %c0_5 = arith.constant 0 : index
    %c0_6 = arith.constant 0 : index
    %24 = vector.load %arg5[%c0_5, %c0_6] : memref<8x436xf32, #tpu.memory_space<vmem>>, vector<8x128xf32>
    tpu.vector_store %arg5[%c0_5, %c0_6], %21 {strides = array<i32>} : memref<8x436xf32, #tpu.memory_space<vmem>>, vector<8x128xf32>,
    %c0_7 = arith.constant 0 : index
    %c416 = arith.constant 416 : index
    %25 = vector.load %arg4[%c0_7, %c416] : memref<8x436xf32, #tpu.memory_space<vmem>>, vector<8x20xf32>
    tpu.vector_store %arg4[%c0_7, %c416], %22 {strides = array<i32>} : memref<8x436xf32, #tpu.memory_space<vmem>>, vector<8x20xf32>,
    %c0_8 = arith.constant 0 : index
    %c416_9 = arith.constant 416 : index
    %26 = vector.load %arg5[%c0_8, %c416_9] : memref<8x436xf32, #tpu.memory_space<vmem>>, vector<8x20xf32>
    tpu.vector_store %arg5[%c0_8, %c416_9], %22 {strides = array<i32>} : memref<8x436xf32, #tpu.memory_space<vmem>>, vector<8x20xf32>,
    %27 = tpu.iota {dimensions = array<i32: 0>} : vector<8x288xi32>
    %c0_i32_10 = arith.constant 0 : i32
    %28 = vector.broadcast %c0_i32_10 : i32 to vector<8x288xi32>
    %29 = arith.cmpi eq, %27, %28 : vector<8x288xi32>
    %30 = arith.extui %29 : vector<8x288xi1> to vector<8x288xi32>
    %31 = arith.sitofp %30 : vector<8x288xi32> to vector<8x288xf32>
    %c72 = arith.constant 72 : index
    %c0_11 = arith.constant 0 : index
    %32 = vector.load %arg6[%c72, %c0_11] : memref<80x288xf32, #tpu.memory_space<vmem>>, vector<8x288xf32>
    tpu.vector_store %arg6[%c72, %c0_11], %31 {strides = array<i32>} : memref<80x288xf32, #tpu.memory_space<vmem>>, vector<8x288xf32>,
    %c0_12 = arith.constant 0 : index
    %c0_13 = arith.constant 0 : index
    %c109 = arith.constant 109 : index
    %33 = vector.load %arg1[%c0_12, %c0_13, %c109] : memref<1x8x436xf32, #tpu.memory_space<vmem>>, vector<1x8x288xf32>
    %34 = vector.shape_cast %33 : vector<1x8x288xf32> to vector<8x288xf32>
    %c0_14 = arith.constant 0 : index
    %c0_15 = arith.constant 0 : index
    %35 = vector.load %arg6[%c0_14, %c0_15] : memref<80x288xf32, #tpu.memory_space<vmem>>, vector<8x288xf32>
    tpu.vector_store %arg6[%c0_14, %c0_15], %34 {strides = array<i32>} : memref<80x288xf32, #tpu.memory_space<vmem>>, vector<8x288xf32>,
    %c0_16 = arith.constant 0 : index
    %c0_17 = arith.constant 0 : index
    %c110 = arith.constant 110 : index
    %36 = vector.load %arg1[%c0_16, %c0_17, %c110] : memref<1x8x436xf32, #tpu.memory_space<vmem>>, vector<1x8x288xf32>
    %37 = vector.shape_cast %36 : vector<1x8x288xf32> to vector<8x288xf32>
    %c8 = arith.constant 8 : index
    %c0_18 = arith.constant 0 : index
    %38 = vector.load %arg6[%c8, %c0_18] : memref<80x288xf32, #tpu.memory_space<vmem>>, vector<8x288xf32>
    tpu.vector_store %arg6[%c8, %c0_18], %37 {strides = array<i32>} : memref<80x288xf32, #tpu.memory_space<vmem>>, vector<8x288xf32>,
    %c0_19 = arith.constant 0 : index
    %c0_20 = arith.constant 0 : index
    %c111 = arith.constant 111 : index
    %39 = vector.load %arg1[%c0_19, %c0_20, %c111] : memref<1x8x436xf32, #tpu.memory_space<vmem>>, vector<1x8x288xf32>
    %40 = vector.shape_cast %39 : vector<1x8x288xf32> to vector<8x288xf32>
    %c16 = arith.constant 16 : index
    %c0_21 = arith.constant 0 : index
    %41 = vector.load %arg6[%c16, %c0_21] : memref<80x288xf32, #tpu.memory_space<vmem>>, vector<8x288xf32>
    tpu.vector_store %arg6[%c16, %c0_21], %40 {strides = array<i32>} : memref<80x288xf32, #tpu.memory_space<vmem>>, vector<8x288xf32>,
    %c0_22 = arith.constant 0 : index
    %c0_23 = arith.constant 0 : index
    %c127 = arith.constant 127 : index
    %42 = vector.load %arg1[%c0_22, %c0_23, %c127] : memref<1x8x436xf32, #tpu.memory_space<vmem>>, vector<1x8x288xf32>
    %43 = vector.shape_cast %42 : vector<1x8x288xf32> to vector<8x288xf32>
    %c24 = arith.constant 24 : index
    %c0_24 = arith.constant 0 : index
    %44 = vector.load %arg6[%c24, %c0_24] : memref<80x288xf32, #tpu.memory_space<vmem>>, vector<8x288xf32>
    tpu.vector_store %arg6[%c24, %c0_24], %43 {strides = array<i32>} : memref<80x288xf32, #tpu.memory_space<vmem>>, vector<8x288xf32>,
    %c0_25 = arith.constant 0 : index
    %c0_26 = arith.constant 0 : index
    %c128 = arith.constant 128 : index
    %45 = vector.load %arg1[%c0_25, %c0_26, %c128] : memref<1x8x436xf32, #tpu.memory_space<vmem>>, vector<1x8x288xf32>
    %46 = vector.shape_cast %45 : vector<1x8x288xf32> to vector<8x288xf32>
    %c32 = arith.constant 32 : index
    %c0_27 = arith.constant 0 : index
    %47 = vector.load %arg6[%c32, %c0_27] : memref<80x288xf32, #tpu.memory_space<vmem>>, vector<8x288xf32>
    tpu.vector_store %arg6[%c32, %c0_27], %46 {strides = array<i32>} : memref<80x288xf32, #tpu.memory_space<vmem>>, vector<8x288xf32>,
    %c0_28 = arith.constant 0 : index
    %c0_29 = arith.constant 0 : index
    %c129 = arith.constant 129 : index
    %48 = vector.load %arg1[%c0_28, %c0_29, %c129] : memref<1x8x436xf32, #tpu.memory_space<vmem>>, vector<1x8x288xf32>
    %49 = vector.shape_cast %48 : vector<1x8x288xf32> to vector<8x288xf32>
    %c40 = arith.constant 40 : index
    %c0_30 = arith.constant 0 : index
    %50 = vector.load %arg6[%c40, %c0_30] : memref<80x288xf32, #tpu.memory_space<vmem>>, vector<8x288xf32>
    tpu.vector_store %arg6[%c40, %c0_30], %49 {strides = array<i32>} : memref<80x288xf32, #tpu.memory_space<vmem>>, vector<8x288xf32>,
    %c0_31 = arith.constant 0 : index
    %c0_32 = arith.constant 0 : index
    %c145 = arith.constant 145 : index
    %51 = vector.load %arg1[%c0_31, %c0_32, %c145] : memref<1x8x436xf32, #tpu.memory_space<vmem>>, vector<1x8x288xf32>
    %52 = vector.shape_cast %51 : vector<1x8x288xf32> to vector<8x288xf32>
    %c48 = arith.constant 48 : index
    %c0_33 = arith.constant 0 : index
    %53 = vector.load %arg6[%c48, %c0_33] : memref<80x288xf32, #tpu.memory_space<vmem>>, vector<8x288xf32>
    tpu.vector_store %arg6[%c48, %c0_33], %52 {strides = array<i32>} : memref<80x288xf32, #tpu.memory_space<vmem>>, vector<8x288xf32>,
    %c0_34 = arith.constant 0 : index
    %c0_35 = arith.constant 0 : index
    %c146 = arith.constant 146 : index
    %54 = vector.load %arg1[%c0_34, %c0_35, %c146] : memref<1x8x436xf32, #tpu.memory_space<vmem>>, vector<1x8x288xf32>
    %55 = vector.shape_cast %54 : vector<1x8x288xf32> to vector<8x288xf32>
    %c56 = arith.constant 56 : index
    %c0_36 = arith.constant 0 : index
    %56 = vector.load %arg6[%c56, %c0_36] : memref<80x288xf32, #tpu.memory_space<vmem>>, vector<8x288xf32>
    tpu.vector_store %arg6[%c56, %c0_36], %55 {strides = array<i32>} : memref<80x288xf32, #tpu.memory_space<vmem>>, vector<8x288xf32>,
    %c0_37 = arith.constant 0 : index
    %c0_38 = arith.constant 0 : index
    %c147 = arith.constant 147 : index
    %57 = vector.load %arg1[%c0_37, %c0_38, %c147] : memref<1x8x436xf32, #tpu.memory_space<vmem>>, vector<1x8x288xf32>
    %58 = vector.shape_cast %57 : vector<1x8x288xf32> to vector<8x288xf32>
    %c64 = arith.constant 64 : index
    %c0_39 = arith.constant 0 : index
    %59 = vector.load %arg6[%c64, %c0_39] : memref<80x288xf32, #tpu.memory_space<vmem>>, vector<8x288xf32>
    tpu.vector_store %arg6[%c64, %c0_39], %58 {strides = array<i32>} : memref<80x288xf32, #tpu.memory_space<vmem>>, vector<8x288xf32>,
    %c0_40 = arith.constant 0 : index
    %c0_41 = arith.constant 0 : index
    %60 = vector.load %arg6[%c0_40, %c0_41] : memref<80x288xf32, #tpu.memory_space<vmem>>, vector<80x288xf32>
    %61 = arith.truncf %60 : vector<80x288xf32> to vector<80x288xbf16>
    %c0_42 = arith.constant 0 : index
    %c0_43 = arith.constant 0 : index
    %c0_44 = arith.constant 0 : index
    %62 = vector.load %arg2[%c0_42, %c0_43, %c0_44] : memref<5x8x80xbf16, #tpu.memory_space<vmem>>, vector<1x8x80xbf16>
    %63 = vector.shape_cast %62 : vector<1x8x80xbf16> to vector<8x80xbf16>
    %cst_45 = arith.constant dense<0.000000e+00> : vector<8x288xf32>
    %64 = tpu.matmul %63, %61, %cst_45 {dimension_numbers = #tpu.dot_dimension_numbers<[1], [0], [0], [1], [0, 0, 1, 1], [], []>} : vector<8x80xbf16>, vector<80x288xbf16>, vector<8x288xf32> -> vector<8x288xf32>
    %cst_46 = arith.constant 0.000000e+00 : f32
    %65 = vector.broadcast %cst_46 : f32 to vector<8x288xf32>
    %66 = arith.maximumf %64, %65 : vector<8x288xf32>
    %67 = arith.mulf %20, %66 : vector<8x288xf32>
    %c0_47 = arith.constant 0 : index
    %c128_48 = arith.constant 128 : index
    %68 = vector.load %arg5[%c0_47, %c128_48] : memref<8x436xf32, #tpu.memory_space<vmem>>, vector<8x288xf32>
    tpu.vector_store %arg5[%c0_47, %c128_48], %67 {strides = array<i32>} : memref<8x436xf32, #tpu.memory_space<vmem>>, vector<8x288xf32>,
    %c0_49 = arith.constant 0 : index
    %c109_50 = arith.constant 109 : index
    %69 = vector.load %arg5[%c0_49, %c109_50] : memref<8x436xf32, #tpu.memory_space<vmem>>, vector<8x288xf32>
    %c0_51 = arith.constant 0 : index
    %c0_52 = arith.constant 0 : index
    %70 = vector.load %arg6[%c0_51, %c0_52] : memref<80x288xf32, #tpu.memory_space<vmem>>, vector<8x288xf32>
    tpu.vector_store %arg6[%c0_51, %c0_52], %69 {strides = array<i32>} : memref<80x288xf32, #tpu.memory_space<vmem>>, vector<8x288xf32>,
    %c0_53 = arith.constant 0 : index
    %c110_54 = arith.constant 110 : index
    %71 = vector.load %arg5[%c0_53, %c110_54] : memref<8x436xf32, #tpu.memory_space<vmem>>, vector<8x288xf32>
    %c8_55 = arith.constant 8 : index
    %c0_56 = arith.constant 0 : index
    %72 = vector.load %arg6[%c8_55, %c0_56] : memref<80x288xf32, #tpu.memory_space<vmem>>, vector<8x288xf32>
    tpu.vector_store %arg6[%c8_55, %c0_56], %71 {strides = array<i32>} : memref<80x288xf32, #tpu.memory_space<vmem>>, vector<8x288xf32>,
    %c0_57 = arith.constant 0 : index
    %c111_58 = arith.constant 111 : index
    %73 = vector.load %arg5[%c0_57, %c111_58] : memref<8x436xf32, #tpu.memory_space<vmem>>, vector<8x288xf32>
    %c16_59 = arith.constant 16 : index
    %c0_60 = arith.constant 0 : index
    %74 = vector.load %arg6[%c16_59, %c0_60] : memref<80x288xf32, #tpu.memory_space<vmem>>, vector<8x288xf32>
    tpu.vector_store %arg6[%c16_59, %c0_60], %73 {strides = array<i32>} : memref<80x288xf32, #tpu.memory_space<vmem>>, vector<8x288xf32>,
    %c0_61 = arith.constant 0 : index
    %c127_62 = arith.constant 127 : index
    %75 = vector.load %arg5[%c0_61, %c127_62] : memref<8x436xf32, #tpu.memory_space<vmem>>, vector<8x288xf32>
    %c24_63 = arith.constant 24 : index
    %c0_64 = arith.constant 0 : index
    %76 = vector.load %arg6[%c24_63, %c0_64] : memref<80x288xf32, #tpu.memory_space<vmem>>, vector<8x288xf32>
    tpu.vector_store %arg6[%c24_63, %c0_64], %75 {strides = array<i32>} : memref<80x288xf32, #tpu.memory_space<vmem>>, vector<8x288xf32>,
    %c0_65 = arith.constant 0 : index
    %c128_66 = arith.constant 128 : index
    %77 = vector.load %arg5[%c0_65, %c128_66] : memref<8x436xf32, #tpu.memory_space<vmem>>, vector<8x288xf32>
    %c32_67 = arith.constant 32 : index
    %c0_68 = arith.constant 0 : index
    %78 = vector.load %arg6[%c32_67, %c0_68] : memref<80x288xf32, #tpu.memory_space<vmem>>, vector<8x288xf32>
    tpu.vector_store %arg6[%c32_67, %c0_68], %77 {strides = array<i32>} : memref<80x288xf32, #tpu.memory_space<vmem>>, vector<8x288xf32>,
    %c0_69 = arith.constant 0 : index
    %c129_70 = arith.constant 129 : index
    %79 = vector.load %arg5[%c0_69, %c129_70] : memref<8x436xf32, #tpu.memory_space<vmem>>, vector<8x288xf32>
    %c40_71 = arith.constant 40 : index
    %c0_72 = arith.constant 0 : index
    %80 = vector.load %arg6[%c40_71, %c0_72] : memref<80x288xf32, #tpu.memory_space<vmem>>, vector<8x288xf32>
    tpu.vector_store %arg6[%c40_71, %c0_72], %79 {strides = array<i32>} : memref<80x288xf32, #tpu.memory_space<vmem>>, vector<8x288xf32>,
    %c0_73 = arith.constant 0 : index
    %c145_74 = arith.constant 145 : index
    %81 = vector.load %arg5[%c0_73, %c145_74] : memref<8x436xf32, #tpu.memory_space<vmem>>, vector<8x288xf32>
    %c48_75 = arith.constant 48 : index
    %c0_76 = arith.constant 0 : index
    %82 = vector.load %arg6[%c48_75, %c0_76] : memref<80x288xf32, #tpu.memory_space<vmem>>, vector<8x288xf32>
    tpu.vector_store %arg6[%c48_75, %c0_76], %81 {strides = array<i32>} : memref<80x288xf32, #tpu.memory_space<vmem>>, vector<8x288xf32>,
    %c0_77 = arith.constant 0 : index
    %c146_78 = arith.constant 146 : index
    %83 = vector.load %arg5[%c0_77, %c146_78] : memref<8x436xf32, #tpu.memory_space<vmem>>, vector<8x288xf32>
    %c56_79 = arith.constant 56 : index
    %c0_80 = arith.constant 0 : index
    %84 = vector.load %arg6[%c56_79, %c0_80] : memref<80x288xf32, #tpu.memory_space<vmem>>, vector<8x288xf32>
    tpu.vector_store %arg6[%c56_79, %c0_80], %83 {strides = array<i32>} : memref<80x288xf32, #tpu.memory_space<vmem>>, vector<8x288xf32>,
    %c0_81 = arith.constant 0 : index
    %c147_82 = arith.constant 147 : index
    %85 = vector.load %arg5[%c0_81, %c147_82] : memref<8x436xf32, #tpu.memory_space<vmem>>, vector<8x288xf32>
    %c64_83 = arith.constant 64 : index
    %c0_84 = arith.constant 0 : index
    %86 = vector.load %arg6[%c64_83, %c0_84] : memref<80x288xf32, #tpu.memory_space<vmem>>, vector<8x288xf32>
    tpu.vector_store %arg6[%c64_83, %c0_84], %85 {strides = array<i32>} : memref<80x288xf32, #tpu.memory_space<vmem>>, vector<8x288xf32>,
    %c0_85 = arith.constant 0 : index
    %c0_86 = arith.constant 0 : index
    %87 = vector.load %arg6[%c0_85, %c0_86] : memref<80x288xf32, #tpu.memory_space<vmem>>, vector<80x288xf32>
    %88 = arith.truncf %87 : vector<80x288xf32> to vector<80x288xbf16>
    %c1 = arith.constant 1 : index
    %c0_87 = arith.constant 0 : index
    %c0_88 = arith.constant 0 : index
    %89 = vector.load %arg2[%c1, %c0_87, %c0_88] : memref<5x8x80xbf16, #tpu.memory_space<vmem>>, vector<1x8x80xbf16>
    %90 = vector.shape_cast %89 : vector<1x8x80xbf16> to vector<8x80xbf16>
    %cst_89 = arith.constant dense<0.000000e+00> : vector<8x288xf32>
    %91 = tpu.matmul %90, %88, %cst_89 {dimension_numbers = #tpu.dot_dimension_numbers<[1], [0], [0], [1], [0, 0, 1, 1], [], []>} : vector<8x80xbf16>, vector<80x288xbf16>, vector<8x288xf32> -> vector<8x288xf32>
    %c0_90 = arith.constant 0 : index
    %c0_91 = arith.constant 0 : index
    %c128_92 = arith.constant 128 : index
    %92 = vector.load %arg1[%c0_90, %c0_91, %c128_92] : memref<1x8x436xf32, #tpu.memory_space<vmem>>, vector<1x8x288xf32>
    %93 = vector.shape_cast %92 : vector<1x8x288xf32> to vector<8x288xf32>
    %94 = arith.mulf %20, %91 : vector<8x288xf32>
    %95 = arith.addf %93, %94 : vector<8x288xf32>
    %c0_93 = arith.constant 0 : index
    %c128_94 = arith.constant 128 : index
    %96 = vector.load %arg4[%c0_93, %c128_94] : memref<8x436xf32, #tpu.memory_space<vmem>>, vector<8x288xf32>
    tpu.vector_store %arg4[%c0_93, %c128_94], %95 {strides = array<i32>} : memref<8x436xf32, #tpu.memory_space<vmem>>, vector<8x288xf32>,
    %c0_95 = arith.constant 0 : index
    %c109_96 = arith.constant 109 : index
    %97 = vector.load %arg4[%c0_95, %c109_96] : memref<8x436xf32, #tpu.memory_space<vmem>>, vector<8x288xf32>
    %c0_97 = arith.constant 0 : index
    %c0_98 = arith.constant 0 : index
    %98 = vector.load %arg6[%c0_97, %c0_98] : memref<80x288xf32, #tpu.memory_space<vmem>>, vector<8x288xf32>
    tpu.vector_store %arg6[%c0_97, %c0_98], %97 {strides = array<i32>} : memref<80x288xf32, #tpu.memory_space<vmem>>, vector<8x288xf32>,
    %c0_99 = arith.constant 0 : index
    %c110_100 = arith.constant 110 : index
    %99 = vector.load %arg4[%c0_99, %c110_100] : memref<8x436xf32, #tpu.memory_space<vmem>>, vector<8x288xf32>
    %c8_101 = arith.constant 8 : index
    %c0_102 = arith.constant 0 : index
    %100 = vector.load %arg6[%c8_101, %c0_102] : memref<80x288xf32, #tpu.memory_space<vmem>>, vector<8x288xf32>
    tpu.vector_store %arg6[%c8_101, %c0_102], %99 {strides = array<i32>} : memref<80x288xf32, #tpu.memory_space<vmem>>, vector<8x288xf32>,
    %c0_103 = arith.constant 0 : index
    %c111_104 = arith.constant 111 : index
    %101 = vector.load %arg4[%c0_103, %c111_104] : memref<8x436xf32, #tpu.memory_space<vmem>>, vector<8x288xf32>
    %c16_105 = arith.constant 16 : index
    %c0_106 = arith.constant 0 : index
    %102 = vector.load %arg6[%c16_105, %c0_106] : memref<80x288xf32, #tpu.memory_space<vmem>>, vector<8x288xf32>
    tpu.vector_store %arg6[%c16_105, %c0_106], %101 {strides = array<i32>} : memref<80x288xf32, #tpu.memory_space<vmem>>, vector<8x288xf32>,
    %c0_107 = arith.constant 0 : index
    %c127_108 = arith.constant 127 : index
    %103 = vector.load %arg4[%c0_107, %c127_108] : memref<8x436xf32, #tpu.memory_space<vmem>>, vector<8x288xf32>
    %c24_109 = arith.constant 24 : index
    %c0_110 = arith.constant 0 : index
    %104 = vector.load %arg6[%c24_109, %c0_110] : memref<80x288xf32, #tpu.memory_space<vmem>>, vector<8x288xf32>
    tpu.vector_store %arg6[%c24_109, %c0_110], %103 {strides = array<i32>} : memref<80x288xf32, #tpu.memory_space<vmem>>, vector<8x288xf32>,
    %c0_111 = arith.constant 0 : index
    %c128_112 = arith.constant 128 : index
    %105 = vector.load %arg4[%c0_111, %c128_112] : memref<8x436xf32, #tpu.memory_space<vmem>>, vector<8x288xf32>
    %c32_113 = arith.constant 32 : index
    %c0_114 = arith.constant 0 : index
    %106 = vector.load %arg6[%c32_113, %c0_114] : memref<80x288xf32, #tpu.memory_space<vmem>>, vector<8x288xf32>
    tpu.vector_store %arg6[%c32_113, %c0_114], %105 {strides = array<i32>} : memref<80x288xf32, #tpu.memory_space<vmem>>, vector<8x288xf32>,
    %c0_115 = arith.constant 0 : index
    %c129_116 = arith.constant 129 : index
    %107 = vector.load %arg4[%c0_115, %c129_116] : memref<8x436xf32, #tpu.memory_space<vmem>>, vector<8x288xf32>
    %c40_117 = arith.constant 40 : index
    %c0_118 = arith.constant 0 : index
    %108 = vector.load %arg6[%c40_117, %c0_118] : memref<80x288xf32, #tpu.memory_space<vmem>>, vector<8x288xf32>
    tpu.vector_store %arg6[%c40_117, %c0_118], %107 {strides = array<i32>} : memref<80x288xf32, #tpu.memory_space<vmem>>, vector<8x288xf32>,
    %c0_119 = arith.constant 0 : index
    %c145_120 = arith.constant 145 : index
    %109 = vector.load %arg4[%c0_119, %c145_120] : memref<8x436xf32, #tpu.memory_space<vmem>>, vector<8x288xf32>
    %c48_121 = arith.constant 48 : index
    %c0_122 = arith.constant 0 : index
    %110 = vector.load %arg6[%c48_121, %c0_122] : memref<80x288xf32, #tpu.memory_space<vmem>>, vector<8x288xf32>
    tpu.vector_store %arg6[%c48_121, %c0_122], %109 {strides = array<i32>} : memref<80x288xf32, #tpu.memory_space<vmem>>, vector<8x288xf32>,
    %c0_123 = arith.constant 0 : index
    %c146_124 = arith.constant 146 : index
    %111 = vector.load %arg4[%c0_123, %c146_124] : memref<8x436xf32, #tpu.memory_space<vmem>>, vector<8x288xf32>
    %c56_125 = arith.constant 56 : index
    %c0_126 = arith.constant 0 : index
    %112 = vector.load %arg6[%c56_125, %c0_126] : memref<80x288xf32, #tpu.memory_space<vmem>>, vector<8x288xf32>
    tpu.vector_store %arg6[%c56_125, %c0_126], %111 {strides = array<i32>} : memref<80x288xf32, #tpu.memory_space<vmem>>, vector<8x288xf32>,
    %c0_127 = arith.constant 0 : index
    %c147_128 = arith.constant 147 : index
    %113 = vector.load %arg4[%c0_127, %c147_128] : memref<8x436xf32, #tpu.memory_space<vmem>>, vector<8x288xf32>
    %c64_129 = arith.constant 64 : index
    %c0_130 = arith.constant 0 : index
    %114 = vector.load %arg6[%c64_129, %c0_130] : memref<80x288xf32, #tpu.memory_space<vmem>>, vector<8x288xf32>
    tpu.vector_store %arg6[%c64_129, %c0_130], %113 {strides = array<i32>} : memref<80x288xf32, #tpu.memory_space<vmem>>, vector<8x288xf32>,
    %c0_131 = arith.constant 0 : index
    %c0_132 = arith.constant 0 : index
    %115 = vector.load %arg6[%c0_131, %c0_132] : memref<80x288xf32, #tpu.memory_space<vmem>>, vector<80x288xf32>
    %116 = arith.truncf %115 : vector<80x288xf32> to vector<80x288xbf16>
    %c2 = arith.constant 2 : index
    %c0_133 = arith.constant 0 : index
    %c0_134 = arith.constant 0 : index
    %117 = vector.load %arg2[%c2, %c0_133, %c0_134] : memref<5x8x80xbf16, #tpu.memory_space<vmem>>, vector<1x8x80xbf16>
    %118 = vector.shape_cast %117 : vector<1x8x80xbf16> to vector<8x80xbf16>
    %cst_135 = arith.constant dense<0.000000e+00> : vector<8x288xf32>
    %119 = tpu.matmul %118, %116, %cst_135 {dimension_numbers = #tpu.dot_dimension_numbers<[1], [0], [0], [1], [0, 0, 1, 1], [], []>} : vector<8x80xbf16>, vector<80x288xbf16>, vector<8x288xf32> -> vector<8x288xf32>
    %cst_136 = arith.constant 0.000000e+00 : f32
    %120 = vector.broadcast %cst_136 : f32 to vector<8x288xf32>
    %121 = arith.maximumf %119, %120 : vector<8x288xf32>
    %122 = arith.mulf %20, %121 : vector<8x288xf32>
    %c0_137 = arith.constant 0 : index
    %c128_138 = arith.constant 128 : index
    %123 = vector.load %arg5[%c0_137, %c128_138] : memref<8x436xf32, #tpu.memory_space<vmem>>, vector<8x288xf32>
    tpu.vector_store %arg5[%c0_137, %c128_138], %122 {strides = array<i32>} : memref<8x436xf32, #tpu.memory_space<vmem>>, vector<8x288xf32>,
    %c0_139 = arith.constant 0 : index
    %c109_140 = arith.constant 109 : index
    %124 = vector.load %arg5[%c0_139, %c109_140] : memref<8x436xf32, #tpu.memory_space<vmem>>, vector<8x288xf32>
    %c0_141 = arith.constant 0 : index
    %c0_142 = arith.constant 0 : index
    %125 = vector.load %arg6[%c0_141, %c0_142] : memref<80x288xf32, #tpu.memory_space<vmem>>, vector<8x288xf32>
    tpu.vector_store %arg6[%c0_141, %c0_142], %124 {strides = array<i32>} : memref<80x288xf32, #tpu.memory_space<vmem>>, vector<8x288xf32>,
    %c0_143 = arith.constant 0 : index
    %c110_144 = arith.constant 110 : index
    %126 = vector.load %arg5[%c0_143, %c110_144] : memref<8x436xf32, #tpu.memory_space<vmem>>, vector<8x288xf32>
    %c8_145 = arith.constant 8 : index
    %c0_146 = arith.constant 0 : index
    %127 = vector.load %arg6[%c8_145, %c0_146] : memref<80x288xf32, #tpu.memory_space<vmem>>, vector<8x288xf32>
    tpu.vector_store %arg6[%c8_145, %c0_146], %126 {strides = array<i32>} : memref<80x288xf32, #tpu.memory_space<vmem>>, vector<8x288xf32>,
    %c0_147 = arith.constant 0 : index
    %c111_148 = arith.constant 111 : index
    %128 = vector.load %arg5[%c0_147, %c111_148] : memref<8x436xf32, #tpu.memory_space<vmem>>, vector<8x288xf32>
    %c16_149 = arith.constant 16 : index
    %c0_150 = arith.constant 0 : index
    %129 = vector.load %arg6[%c16_149, %c0_150] : memref<80x288xf32, #tpu.memory_space<vmem>>, vector<8x288xf32>
    tpu.vector_store %arg6[%c16_149, %c0_150], %128 {strides = array<i32>} : memref<80x288xf32, #tpu.memory_space<vmem>>, vector<8x288xf32>,
    %c0_151 = arith.constant 0 : index
    %c127_152 = arith.constant 127 : index
    %130 = vector.load %arg5[%c0_151, %c127_152] : memref<8x436xf32, #tpu.memory_space<vmem>>, vector<8x288xf32>
    %c24_153 = arith.constant 24 : index
    %c0_154 = arith.constant 0 : index
    %131 = vector.load %arg6[%c24_153, %c0_154] : memref<80x288xf32, #tpu.memory_space<vmem>>, vector<8x288xf32>
    tpu.vector_store %arg6[%c24_153, %c0_154], %130 {strides = array<i32>} : memref<80x288xf32, #tpu.memory_space<vmem>>, vector<8x288xf32>,
    %c0_155 = arith.constant 0 : index
    %c128_156 = arith.constant 128 : index
    %132 = vector.load %arg5[%c0_155, %c128_156] : memref<8x436xf32, #tpu.memory_space<vmem>>, vector<8x288xf32>
    %c32_157 = arith.constant 32 : index
    %c0_158 = arith.constant 0 : index
    %133 = vector.load %arg6[%c32_157, %c0_158] : memref<80x288xf32, #tpu.memory_space<vmem>>, vector<8x288xf32>
    tpu.vector_store %arg6[%c32_157, %c0_158], %132 {strides = array<i32>} : memref<80x288xf32, #tpu.memory_space<vmem>>, vector<8x288xf32>,
    %c0_159 = arith.constant 0 : index
    %c129_160 = arith.constant 129 : index
    %134 = vector.load %arg5[%c0_159, %c129_160] : memref<8x436xf32, #tpu.memory_space<vmem>>, vector<8x288xf32>
    %c40_161 = arith.constant 40 : index
    %c0_162 = arith.constant 0 : index
    %135 = vector.load %arg6[%c40_161, %c0_162] : memref<80x288xf32, #tpu.memory_space<vmem>>, vector<8x288xf32>
    tpu.vector_store %arg6[%c40_161, %c0_162], %134 {strides = array<i32>} : memref<80x288xf32, #tpu.memory_space<vmem>>, vector<8x288xf32>,
    %c0_163 = arith.constant 0 : index
    %c145_164 = arith.constant 145 : index
    %136 = vector.load %arg5[%c0_163, %c145_164] : memref<8x436xf32, #tpu.memory_space<vmem>>, vector<8x288xf32>
    %c48_165 = arith.constant 48 : index
    %c0_166 = arith.constant 0 : index
    %137 = vector.load %arg6[%c48_165, %c0_166] : memref<80x288xf32, #tpu.memory_space<vmem>>, vector<8x288xf32>
    tpu.vector_store %arg6[%c48_165, %c0_166], %136 {strides = array<i32>} : memref<80x288xf32, #tpu.memory_space<vmem>>, vector<8x288xf32>,
    %c0_167 = arith.constant 0 : index
    %c146_168 = arith.constant 146 : index
    %138 = vector.load %arg5[%c0_167, %c146_168] : memref<8x436xf32, #tpu.memory_space<vmem>>, vector<8x288xf32>
    %c56_169 = arith.constant 56 : index
    %c0_170 = arith.constant 0 : index
    %139 = vector.load %arg6[%c56_169, %c0_170] : memref<80x288xf32, #tpu.memory_space<vmem>>, vector<8x288xf32>
    tpu.vector_store %arg6[%c56_169, %c0_170], %138 {strides = array<i32>} : memref<80x288xf32, #tpu.memory_space<vmem>>, vector<8x288xf32>,
    %c0_171 = arith.constant 0 : index
    %c147_172 = arith.constant 147 : index
    %140 = vector.load %arg5[%c0_171, %c147_172] : memref<8x436xf32, #tpu.memory_space<vmem>>, vector<8x288xf32>
    %c64_173 = arith.constant 64 : index
    %c0_174 = arith.constant 0 : index
    %141 = vector.load %arg6[%c64_173, %c0_174] : memref<80x288xf32, #tpu.memory_space<vmem>>, vector<8x288xf32>
    tpu.vector_store %arg6[%c64_173, %c0_174], %140 {strides = array<i32>} : memref<80x288xf32, #tpu.memory_space<vmem>>, vector<8x288xf32>,
    %c0_175 = arith.constant 0 : index
    %c0_176 = arith.constant 0 : index
    %142 = vector.load %arg6[%c0_175, %c0_176] : memref<80x288xf32, #tpu.memory_space<vmem>>, vector<80x288xf32>
    %143 = arith.truncf %142 : vector<80x288xf32> to vector<80x288xbf16>
    %c3 = arith.constant 3 : index
    %c0_177 = arith.constant 0 : index
    %c0_178 = arith.constant 0 : index
    %144 = vector.load %arg2[%c3, %c0_177, %c0_178] : memref<5x8x80xbf16, #tpu.memory_space<vmem>>, vector<1x8x80xbf16>
    %145 = vector.shape_cast %144 : vector<1x8x80xbf16> to vector<8x80xbf16>
    %cst_179 = arith.constant dense<0.000000e+00> : vector<8x288xf32>
    %146 = tpu.matmul %145, %143, %cst_179 {dimension_numbers = #tpu.dot_dimension_numbers<[1], [0], [0], [1], [0, 0, 1, 1], [], []>} : vector<8x80xbf16>, vector<80x288xbf16>, vector<8x288xf32> -> vector<8x288xf32>
    %c0_180 = arith.constant 0 : index
    %c128_181 = arith.constant 128 : index
    %147 = vector.load %arg4[%c0_180, %c128_181] : memref<8x436xf32, #tpu.memory_space<vmem>>, vector<8x288xf32>
    %148 = arith.mulf %20, %146 : vector<8x288xf32>
    %149 = arith.addf %147, %148 : vector<8x288xf32>
    %c0_182 = arith.constant 0 : index
    %c128_183 = arith.constant 128 : index
    %150 = vector.load %arg4[%c0_182, %c128_183] : memref<8x436xf32, #tpu.memory_space<vmem>>, vector<8x288xf32>
    tpu.vector_store %arg4[%c0_182, %c128_183], %149 {strides = array<i32>} : memref<8x436xf32, #tpu.memory_space<vmem>>, vector<8x288xf32>,
    %c0_184 = arith.constant 0 : index
    %c109_185 = arith.constant 109 : index
    %151 = vector.load %arg4[%c0_184, %c109_185] : memref<8x436xf32, #tpu.memory_space<vmem>>, vector<8x288xf32>
    %c0_186 = arith.constant 0 : index
    %c0_187 = arith.constant 0 : index
    %152 = vector.load %arg6[%c0_186, %c0_187] : memref<80x288xf32, #tpu.memory_space<vmem>>, vector<8x288xf32>
    tpu.vector_store %arg6[%c0_186, %c0_187], %151 {strides = array<i32>} : memref<80x288xf32, #tpu.memory_space<vmem>>, vector<8x288xf32>,
    %c0_188 = arith.constant 0 : index
    %c110_189 = arith.constant 110 : index
    %153 = vector.load %arg4[%c0_188, %c110_189] : memref<8x436xf32, #tpu.memory_space<vmem>>, vector<8x288xf32>
    %c8_190 = arith.constant 8 : index
    %c0_191 = arith.constant 0 : index
    %154 = vector.load %arg6[%c8_190, %c0_191] : memref<80x288xf32, #tpu.memory_space<vmem>>, vector<8x288xf32>
    tpu.vector_store %arg6[%c8_190, %c0_191], %153 {strides = array<i32>} : memref<80x288xf32, #tpu.memory_space<vmem>>, vector<8x288xf32>,
    %c0_192 = arith.constant 0 : index
    %c111_193 = arith.constant 111 : index
    %155 = vector.load %arg4[%c0_192, %c111_193] : memref<8x436xf32, #tpu.memory_space<vmem>>, vector<8x288xf32>
    %c16_194 = arith.constant 16 : index
    %c0_195 = arith.constant 0 : index
    %156 = vector.load %arg6[%c16_194, %c0_195] : memref<80x288xf32, #tpu.memory_space<vmem>>, vector<8x288xf32>
    tpu.vector_store %arg6[%c16_194, %c0_195], %155 {strides = array<i32>} : memref<80x288xf32, #tpu.memory_space<vmem>>, vector<8x288xf32>,
    %c0_196 = arith.constant 0 : index
    %c127_197 = arith.constant 127 : index
    %157 = vector.load %arg4[%c0_196, %c127_197] : memref<8x436xf32, #tpu.memory_space<vmem>>, vector<8x288xf32>
    %c24_198 = arith.constant 24 : index
    %c0_199 = arith.constant 0 : index
    %158 = vector.load %arg6[%c24_198, %c0_199] : memref<80x288xf32, #tpu.memory_space<vmem>>, vector<8x288xf32>
    tpu.vector_store %arg6[%c24_198, %c0_199], %157 {strides = array<i32>} : memref<80x288xf32, #tpu.memory_space<vmem>>, vector<8x288xf32>,
    %c0_200 = arith.constant 0 : index
    %c128_201 = arith.constant 128 : index
    %159 = vector.load %arg4[%c0_200, %c128_201] : memref<8x436xf32, #tpu.memory_space<vmem>>, vector<8x288xf32>
    %c32_202 = arith.constant 32 : index
    %c0_203 = arith.constant 0 : index
    %160 = vector.load %arg6[%c32_202, %c0_203] : memref<80x288xf32, #tpu.memory_space<vmem>>, vector<8x288xf32>
    tpu.vector_store %arg6[%c32_202, %c0_203], %159 {strides = array<i32>} : memref<80x288xf32, #tpu.memory_space<vmem>>, vector<8x288xf32>,
    %c0_204 = arith.constant 0 : index
    %c129_205 = arith.constant 129 : index
    %161 = vector.load %arg4[%c0_204, %c129_205] : memref<8x436xf32, #tpu.memory_space<vmem>>, vector<8x288xf32>
    %c40_206 = arith.constant 40 : index
    %c0_207 = arith.constant 0 : index
    %162 = vector.load %arg6[%c40_206, %c0_207] : memref<80x288xf32, #tpu.memory_space<vmem>>, vector<8x288xf32>
    tpu.vector_store %arg6[%c40_206, %c0_207], %161 {strides = array<i32>} : memref<80x288xf32, #tpu.memory_space<vmem>>, vector<8x288xf32>,
    %c0_208 = arith.constant 0 : index
    %c145_209 = arith.constant 145 : index
    %163 = vector.load %arg4[%c0_208, %c145_209] : memref<8x436xf32, #tpu.memory_space<vmem>>, vector<8x288xf32>
    %c48_210 = arith.constant 48 : index
    %c0_211 = arith.constant 0 : index
    %164 = vector.load %arg6[%c48_210, %c0_211] : memref<80x288xf32, #tpu.memory_space<vmem>>, vector<8x288xf32>
    tpu.vector_store %arg6[%c48_210, %c0_211], %163 {strides = array<i32>} : memref<80x288xf32, #tpu.memory_space<vmem>>, vector<8x288xf32>,
    %c0_212 = arith.constant 0 : index
    %c146_213 = arith.constant 146 : index
    %165 = vector.load %arg4[%c0_212, %c146_213] : memref<8x436xf32, #tpu.memory_space<vmem>>, vector<8x288xf32>
    %c56_214 = arith.constant 56 : index
    %c0_215 = arith.constant 0 : index
    %166 = vector.load %arg6[%c56_214, %c0_215] : memref<80x288xf32, #tpu.memory_space<vmem>>, vector<8x288xf32>
    tpu.vector_store %arg6[%c56_214, %c0_215], %165 {strides = array<i32>} : memref<80x288xf32, #tpu.memory_space<vmem>>, vector<8x288xf32>,
    %c0_216 = arith.constant 0 : index
    %c147_217 = arith.constant 147 : index
    %167 = vector.load %arg4[%c0_216, %c147_217] : memref<8x436xf32, #tpu.memory_space<vmem>>, vector<8x288xf32>
    %c64_218 = arith.constant 64 : index
    %c0_219 = arith.constant 0 : index
    %168 = vector.load %arg6[%c64_218, %c0_219] : memref<80x288xf32, #tpu.memory_space<vmem>>, vector<8x288xf32>
    tpu.vector_store %arg6[%c64_218, %c0_219], %167 {strides = array<i32>} : memref<80x288xf32, #tpu.memory_space<vmem>>, vector<8x288xf32>,
    %c0_220 = arith.constant 0 : index
    %c0_221 = arith.constant 0 : index
    %169 = vector.load %arg6[%c0_220, %c0_221] : memref<80x288xf32, #tpu.memory_space<vmem>>, vector<80x288xf32>
    %170 = arith.truncf %169 : vector<80x288xf32> to vector<80x288xbf16>
    %c4 = arith.constant 4 : index
    %c0_222 = arith.constant 0 : index
    %c0_223 = arith.constant 0 : index
    %171 = vector.load %arg2[%c4, %c0_222, %c0_223] : memref<5x8x80xbf16, #tpu.memory_space<vmem>>, vector<1x8x80xbf16>
    %172 = vector.shape_cast %171 : vector<1x8x80xbf16> to vector<8x80xbf16>
    %cst_224 = arith.constant dense<0.000000e+00> : vector<8x288xf32>
    %173 = tpu.matmul %172, %170, %cst_224 {dimension_numbers = #tpu.dot_dimension_numbers<[1], [0], [0], [1], [0, 0, 1, 1], [], []>} : vector<8x80xbf16>, vector<80x288xbf16>, vector<8x288xf32> -> vector<8x288xf32>
    %cst_225 = arith.constant 1.000000e+00 : f32
    %174 = vector.broadcast %cst_225 : f32 to vector<8x288xf32>
    %175 = arith.mulf %173, %174 : vector<8x288xf32>
    %c0_226 = arith.constant 0 : index
    %c0_227 = arith.constant 0 : index
    %c128_228 = arith.constant 128 : index
    %176 = vector.load %arg1[%c0_226, %c0_227, %c128_228] : memref<1x8x436xf32, #tpu.memory_space<vmem>>, vector<1x8x288xf32>
    %177 = vector.shape_cast %176 : vector<1x8x288xf32> to vector<8x288xf32>
    %178 = arith.addf %175, %177 : vector<8x288xf32>
    %c0_229 = arith.constant 0 : index
    %c0_230 = arith.constant 0 : index
    %c0_231 = arith.constant 0 : index
    %179 = vector.load %arg3[%c0_229, %c0_230, %c0_231] : memref<1x8x288xf32, #tpu.memory_space<vmem>>, vector<1x8x288xf32>
    %180 = vector.shape_cast %179 : vector<1x8x288xf32> to vector<8x288xf32>
    %181 = vector.shape_cast %178 : vector<8x288xf32> to vector<1x8x288xf32>
    tpu.vector_store %arg3[%c0_229, %c0_230, %c0_231], %181 {strides = array<i32>} : memref<1x8x288xf32, #tpu.memory_space<vmem>>, vector<1x8x288xf32>,
    return
  }
  func.func @transform_0(%arg0: i32) -> (i32, i32, i32) {
    %c0_i32 = arith.constant 0 : i32
    %c0_i32_0 = arith.constant 0 : i32
    %c0_i32_1 = arith.constant 0 : i32
    return %arg0, %c0_i32, %c0_i32_0 : i32, i32, i32
  }
  func.func @transform_1(%arg0: i32) -> (i32, i32, i32) {
    %c0_i32 = arith.constant 0 : i32
    %c0_i32_0 = arith.constant 0 : i32
    %c0_i32_1 = arith.constant 0 : i32
    %c0_i32_2 = arith.constant 0 : i32
    return %c0_i32, %c0_i32_0, %c0_i32_1 : i32, i32, i32
  }
  func.func @transform_2(%arg0: i32) -> (i32, i32, i32) {
    %c0_i32 = arith.constant 0 : i32
    %c0_i32_0 = arith.constant 0 : i32
    %c0_i32_1 = arith.constant 0 : i32
    return %arg0, %c0_i32, %c0_i32_0 : i32, i32, i32
  }
}

</mosaic_0001>

<bundles_post_ra>
// kernel: tpu_custom_call.1
= control target key start
LH: loop header
LB: loop body
LE: loop exit
PB: predicated region body
PF: predicated region fallthrough
CT: control target
= control target key end

     0   :  { %7 = vsyncpa [#allocation6], 0  ;;  %s3163_s0 = inlined_call_operand.hbm [shape: f32[2,8,436], index: 0, kind: input, shape index: {}]   ;;  %s3164_s1 = inlined_call_operand.hbm [shape: bf16[5,8,80], index: 1, kind: input, shape index: {}]   ;;  %s3165_s2 = inlined_call_operand.hbm [shape: f32[2,8,288], index: 2, kind: output, shape index: {}]  }
   0x1   :  { %9 = vsyncpa [#allocation6 + $0x1], 0 }
   0x2   :  { %10 = vsyncpa [#allocation9], 0 }
   0x3   :  { %11 = vsyncpa [#allocation7], 0 }
   0x4   :  { %13 = vsyncpa [#allocation7 + $0x1], 0  ;;  %s2375_s9 = smov 0   ;;  %s2377_s10 = smov 0  }
   0x5   :  { %s2379_s11 = smov 0   ;;  %s2381_s12 = smov 0  }
   0x6 LB: > { %s2396_s13 = sadd.s32 4294967295, %s2340_s12   ;;  %s1987_s14 = sadd.s32 4294967294, %s2340_s12   ;;  %s2340_s12 = sphi %s2381_s12, %s3207_s12   ;;  %s2336_s11 = sphi %s2379_s11, %s3206_s11   ;;  %s2332_s10 = sphi %s2377_s10, %s3205_s10   ;;  %s2328_s9 = sphi %s2375_s9, %s3204_s9  }
   0x7   : > { %p39_p0 = scmp.ne.s32.totalorder %s2332_s10, %s2328_s9  ;;  %p3166_p1 = scmp.eq.s32.totalorder %s2396_s13, 0 }
   0x8   : > { %p90_p3 = scmp.eq.s32.totalorder %s1987_s14, 1  ;;  %p1988_p5 = scmp.ge.s32.totalorder %s2340_s12, 1 }
   0x9   : > { %p2405_p4 = por %p3166_p1, %p39_p0  ;;  %p97_p7 = scmp.lt.s32.totalorder %s2340_s12, 3 }
   0xa   : > { %p2410_p6 = por %p90_p3, %p39_p0  ;;  %s2342_s18 = smov [#allocation8]  }
   0xb   : > { %s3173_s15 = scalar_select %p2405_p4, 1, 0 }
   0xc   : > { %s3174_s16 = scalar_select %p2410_p6, 1, 0 }
   0xd   : > { %p2415_p8 = pnand %p1988_p5, %p97_p7  ;;  %s109_s19 = sshll.u32 %s2342_s18, 4  ;;  %s2419_s19 = int_to_ptr.vmem [resolvable:$true] %s109_s19 }
   0xe   : > { %s2431_s21 = sadd.s32 1, %s2340_s12   ;;  %s26_s22 = sadd.s32 1, %s2336_s11 }
   0xf   : > { %s3175_s17 = scalar_select %p2415_p8, 1, 0 }
  0x10   : > { %p2131_p9 = pneg %p2415_p8  ;;  %s23_s23 = ssub.s32 %s2340_s12, %s2431_s21 }
  0x11   : > { %s2212_s26 = scalar_lea.hbm %s3164_s1, 320 }
  0x12   : > { %p2426_p11 = pnand %p2131_p9, %p3166_p1  ;;  %p2213_p12 = scmp.ne.s32.totalorder %s3164_s1, %s2212_s26 }
  0x13   : > { %p2219_p5 = scmp.lt.u32.totalorder %s2212_s26, %s3164_s1 }
  0x14   : > { %p2214_p13 = pneg %p2426_p11 }
  0x16   : > { %p2215_p0 = pnand %p2214_p13, %p2213_p12 }
  0x18   : > { %p2216_p3 = pneg %p2215_p0 }
  0x1a   : > { %p2221_p7 = pnand %p2219_p5, %p2216_p3 }
  0x1c   : > { %2224 = shalt.err (!%p2221_p7)
}
  0x1d   : > { %s2225_s3 = scalar_lea.vmem %s2419_s19, 320  ;;  %p2233_p2 = scmp.lt.s32.totalorder %s2419_s19, %s2419_s19 }
  0x1e   : > { %p2226_p9 = scmp.ne.s32.totalorder %s2419_s19, %s2225_s3  ;;  %p2234_p6 = scmp.lt.s32.totalorder %s2225_s3, %s2225_s3 }
  0x20   : > { %p2228_p10 = pnand %p2226_p9, %p2214_p13  ;;  %p2235_p4 = por %p2234_p6, %p2233_p2 }
  0x22   : > { %p2229_p1 = pneg %p2228_p10 }
  0x24   : > { %p2236_p8 = pnand %p2235_p4, %p2229_p1 }
  0x26   : > { %2239 = shalt.err (!%p2236_p8)
}
  0x27   : > { %s2343_s4 = smov 64   ;;  %s2344_s5 = smov 4  }
  0x28   : > { %2134 = dma.hbm_to_vmem [thread:$0]  (!%p2426_p11), %s3164_s1, 320, %s2419_s19, [#allocation9], %s2343_s4, %s2343_s4, %s2344_s5  }
  0x29   : > { %p24_p2 = scmp.eq.s32.totalorder %s23_s23, 0  ;;  %p33_p1 = scmp.ne.s32.totalorder %s2336_s11, %s2332_s10 }
  0x2a   : > { %p34_p4 = scmp.eq.s32.totalorder %s2340_s12, 0  ;;  %p2144_p6 = scmp.lt.s32.totalorder %s2340_s12, 2 }
  0x2b   : > { %s2462_s8 = scalar_select %p24_p2, %s2336_s11, %s26_s22  }
  0x2c   : > { %p35_p8 = por %p34_p4, %p33_p1  ;;  %p3177_p10 = scmp.eq.s32.totalorder %s2396_s13, 1 }
  0x2d   : > { %s123_s18 = sand.u32 1, %s2336_s11   ;;  %s2014_s24 = sshll.u32 %s2340_s12, 9 }
  0x2e   : > { %p2466_p12 = por %p3177_p10, %p33_p1  ;;  %s1991_s25 = sshll.u32 %s123_s18, 5 }
  0x2f   : > { %s2475_s27 = scalar_lea.hbm %s3163_s0, %s2014_s24  ;;  %s127_s19 = scalar_lea.vmem [#allocation5], %s1991_s25 }
  0x30   : > { %s135_s22 = sshll.u32 %s127_s19, 4  ;;  %p2477_p11 = pnand %p2144_p6, %p35_p8  ;;  %s2481_s22 = int_to_ptr.vmem [resolvable:$true] %s135_s22 }
  0x31   : > { %s124_s28 = scalar_lea.sflag [#allocation6], %s123_s18  ;;  %s2240_s29 = scalar_lea.hbm %s2475_s27, 512 }
  0x32   : > { %p2241_p13 = scmp.ne.s32.totalorder %s2475_s27, %s2240_s29  ;;  %p2242_p0 = pneg %p2477_p11 }
  0x33   : > { %s2245_s4 = scalar_lea.hbm %s3163_s0, 1024  ;;  %p2246_p7 = scmp.lt.u32.totalorder %s2475_s27, %s3163_s0 }
  0x34   : > { %p2243_p3 = pnand %p2242_p0, %p2241_p13  ;;  %p2247_p9 = scmp.lt.u32.totalorder %s2245_s4, %s2240_s29 }
  0x35   : > { %p2249_p1 = scmp.lt.u32.totalorder %s2240_s29, %s2475_s27 }
  0x36   : > { %p2244_p5 = pneg %p2243_p3  ;;  %p2248_p2 = por %p2247_p9, %p2246_p7 }
  0x38   : > { %p2250_p4 = por %p2249_p1, %p2248_p2 }
  0x3a   : > { %p2251_p6 = pnand %p2250_p4, %p2244_p5 }
  0x3c   : > { %2254 = shalt.err (!%p2251_p6)
}
  0x3d   : > { %s2255_s7 = scalar_lea.vmem %s2481_s22, 512  ;;  %s2345_s18 = smov [#allocation5]  }
  0x3e   : > { %p2256_p8 = scmp.ne.s32.totalorder %s2481_s22, %s2255_s7  ;;  %s2260_s24 = sshll.u32 %s2345_s18, 4  ;;  %s2261_s24 = int_to_ptr.vmem [resolvable:$false] %s2260_s24 }
  0x3f   : > { %s2262_s25 = scalar_lea.vmem %s2261_s24, 1024  ;;  %p2263_p3 = scmp.lt.s32.totalorder %s2481_s22, %s2261_s24 }
  0x40   : > { %p2258_p10 = pnand %p2256_p8, %p2242_p0  ;;  %p2264_p7 = scmp.lt.s32.totalorder %s2262_s25, %s2255_s7 }
  0x42   : > { %p2259_p13 = pneg %p2258_p10  ;;  %p2265_p9 = por %p2264_p7, %p2263_p3 }
  0x44   : > { %p2266_p2 = pnand %p2265_p9, %p2259_p13 }
  0x46   : > { %2269 = shalt.err (!%p2266_p2)
}
  0x47   : > { %2138 = dma.hbm_to_vmem [thread:$0]  (!%p2477_p11), %s2475_s27, 512, %s2481_s22, %s124_s28  }
  0x48   : > { %p3180_p5 = scmp.ne.s32.totalorder %s3175_s17, 0 }
  0x49   : > { %s2511_s20 = sand.u32 (!%p3180_p5), 1, %s2332_s10   ;;  %p3181_p0 = scmp.ne.s32.totalorder (!%p3180_p5), %s3173_s15, 0 }
  0x4a   : > { %144 = sbr.rel (%p3180_p5) target bundleno = 2087 (0x827), region = 28  ;;  %s1995_s26 = sshll.u32 (!%p3180_p5), %s2511_s20, 5 }
  0x4b   : > { %s147_s19 = scalar_lea.sflag (!%p3180_p5), [#allocation6], %s2511_s20  ;;  %s2515_s29 = scalar_lea.vmem (!%p3180_p5), [#allocation5], %s1995_s26 }
  0x51   : > { %2315 = dma.done.wait (%p3181_p0), %s147_s19, 512  }
  0x52   : > { %2317 = vsyncadd (%p3181_p0), %s147_s19, 4294966784  ;;  %p3182_p11 = scmp.eq.s32.totalorder %s2396_s13, 0 }
  0x54   : > { %2319 = dma.done.wait (%p3182_p11), [#allocation9], 320   ;;  %p3183_p1 = pmov %p3182_p11 }
  0x55   : > { %v2526_v0 = vld [vmem:[%s2515_s29 + $0x8] sm:$0xff]  ;;  %s2346_s17 = smov 18   ;;  %s2347_s27 = smov 19   ;;  %v2533_v1 = vld [vmem:[%s2515_s29 + $0x10] sm:$0xff]  ;;  %v277_v2 = vld [vmem:[%s2515_s29] sm:$0xff]  ;;  %vm249_vm0 = vcmask 261120   ;;  %v176_v5 = vlaneseq }
  0x56   : > { %2321 = vsyncadd (%p3183_p1), [#allocation9], 4294966976  ;;  %287 = vrot.lane.b32.xlu1 %v2526_v0, %s2346_s17  ;;  %261 = vrot.lane.b32.xlu0 %v2526_v0, %s2347_s27  ;;  %v2541_v3 = vld [vmem:[%s2515_s29 + $0x18] sm:$0xff]  ;;  %s2348_s15 = smov 17   ;;  %s2349_s22 = smov 1   ;;  %v2351_v4 = vmov 0.0  }
  0x57   : > { %360 = vst.msk [vmem:[#allocation4 + $0x70] sm:$0xff] %vm249_vm0, %v2541_v3  ;;  %s2350_s23 = smov 127   ;;  %237 = vst [vmem:[#allocation2] sm:$0xff] %v2351_v4  ;;  %2045 = vmatprep.subr.bf16.mxu1 %v2351_v4  ;;  %s2352_s28 = smov 111   ;;  %v2584_v6 = vshrl.u32 %v176_v5, 7  ;;  %vm3169_vm2 = vmmov 0  }
  0x58   : > { %s2353_s30 = smov 110   ;;  %s2354_s3 = smov 109   ;;  %2055 = vmatprep.mubr.msk.bf16.mxu1 %vm3169_vm2, %v2351_v4  ;;  %vm239_vm3 = vcmask 425216   ;;  %v2356_v8 = vmov 0   ;;  %vm293_vm4 = vcmask 146432   ;;  %vm267_vm5 = vcmask 154624  }
  0x59   : > { %vm244_vm1 = vcmp.eq.s32.totalorder %v2584_v6, 0  ;;  %527 = vmatprep.mubr.bf16.mxu0 %v2356_v8  ;;  %241 = vst.msk [vmem:[#allocation3 + $0x18] sm:$0xff] %vm239_vm3, %v2351_v4  ;;  %240 = vst.msk [vmem:[#allocation2 + $0x18] sm:$0xff] %vm239_vm3, %v2351_v4  ;;  %vm319_vm6 = vcmask 138240   ;;  %vm345_vm7 = vcmask 7168   ;;  %vm373_vm8 = vcmask 1039360  }
  0x5a   : > { %289 = vrot.lane.b32.xlu1 %v2533_v1, %s2346_s17  ;;  %263 = vrot.lane.b32.xlu0 %v2533_v1, %s2347_s27  ;;  %v2000_v7 = vsel %vm244_vm1, 1.0, %v2351_v4  ;;  %vm394_vm9 = vcmask 908288   ;;  %vm415_vm10 = vcmask 900096   ;;  %vm3172_vm11 = vcmask 891904   ;;  %s2115_s4 = smul.u32 24, %s2511_s20  ;;  %s2359_s19 = smov [#allocation10]  }
  0x5b   : > { %250 = vst.msk [vmem:[#allocation4 + $0xe8] sm:$0xff] %vm249_vm0, %v2000_v7  ;;  %247 = vst [vmem:[#allocation4 + $0xd8] sm:$0xff] %v2000_v7  ;;  %vm2357_vm12 = vmmov 1   ;;  %vm3171_vm14 = vcmask 654336   ;;  %s2122_s6 = smul.u32 384, %s2396_s13  ;;  %s1893_s13 = scalar_lea.sflag [#allocation7], %s2511_s20 }
  0x5c   : > { %248 = vst [vmem:[#allocation4 + $0xe0] sm:$0xff] %v2000_v7  ;;  %vm2645_vm13 = vmpackc.low %vm244_vm1, %vm2357_vm12  ;;  %s174_s5 = scalar_lea.vmem [#allocation10], %s2115_s4 }
  0x5d   : > { %s1907_s7 = sshll.u32 %s174_s5, 4  ;;  %s3118_s25 = scalar_lea.hbm %s3165_s2, %s2122_s6  ;;  %s3120_s7 = int_to_ptr.vmem [resolvable:$true] %s1907_s7 }
  0x5e   : > { %285 = vrot.lane.b32.xlu1 %v277_v2, %s2346_s17  ;;  %259 = vrot.lane.b32.xlu0 %v277_v2, %s2347_s27  ;;  %s2270_s26 = scalar_lea.vmem %s3120_s7, 384 }
  0x5f   : > { %p2271_p4 = scmp.ne.s32.totalorder %s3120_s7, %s2270_s26 }
  0x61   : > { %p2272_p6 = pnand %p2271_p4, %p2466_p12 }
  0x62   : > { %315 = vrot.lane.b32.xlu1 %v2533_v1, %s2348_s15  ;;  %313 = vrot.lane.b32.xlu0 %v2526_v0, %s2348_s15 }
  0x63   : > { %p2273_p8 = pneg %p2272_p6 }
  0x66   : > { %341 = vrot.lane.b32.xlu1 %v2533_v1, %s2349_s22  ;;  %339 = vrot.lane.b32.xlu0 %v2526_v0, %s2349_s22 }
  0x6a   : > { %337 = vrot.lane.b32.xlu1 %v277_v2, %s2349_s22  ;;  %311 = vrot.lane.b32.xlu0 %v277_v2, %s2348_s15 }
  0x6e   : > { %371 = vrot.lane.b32.xlu1 %v2541_v3, %s2350_s23  ;;  %369 = vrot.lane.b32.xlu0 %v2533_v1, %s2350_s23 }
  0x72   : > { %265 = vrot.lane.b32.xlu1 %v2541_v3, %s2347_s27  ;;  %367 = vrot.lane.b32.xlu0 %v2526_v0, %s2350_s23 }
  0x76   : > { %390 = vrot.lane.b32.xlu1 %v2533_v1, %s2352_s28  ;;  %291 = vrot.lane.b32.xlu0 %v2541_v3, %s2346_s17 }
  0x7a   : > { %411 = vrot.lane.b32.xlu1 %v2533_v1, %s2353_s30  ;;  %392 = vrot.lane.b32.xlu0 %v2541_v3, %s2352_s28 }
  0x7e   : > { %388 = vrot.lane.b32.xlu1 %v2526_v0, %s2352_s28  ;;  %413 = vrot.lane.b32.xlu0 %v2541_v3, %s2353_s30 }
  0x82   : > { %317 = vrot.lane.b32.xlu1 %v2541_v3, %s2348_s15  ;;  %409 = vrot.lane.b32.xlu0 %v2526_v0, %s2353_s30 }
  0x86   : > { %343 = vrot.lane.b32.xlu0 %v2541_v3, %s2349_s22  ;;  %432 = vrot.lane.b32.xlu1 %v2533_v1, %s2354_s3 }
  0x8a   : > { %434 = vrot.lane.b32.xlu0 %v2541_v3, %s2354_s3  ;;  %430 = vrot.lane.b32.xlu1 %v2526_v0, %s2354_s3 }
  0x8e   : > { %618 = vrot.lane.b32.xlu1 %v2351_v4, %s2346_s17  ;;  %593 = vrot.lane.b32.xlu0 %v2351_v4, %s2347_s27 }
  0x92   : > { %668 = vrot.lane.b32.xlu1 %v2351_v4, %s2349_s22  ;;  %643 = vrot.lane.b32.xlu0 %v2351_v4, %s2348_s15 }
  0xc8   : > { %v288_v9 = vpop.permute.xlu1 %287  ;;  %v262_v10 = vpop.permute.xlu0 %261 }
  0xcc   : > { %v290_v11 = vpop.permute.xlu1 %289  ;;  %v264_v12 = vpop.permute.xlu0 %263 }
  0xcd   : > { %v295_v13 = vsel %vm293_vm4, %v288_v9, %v290_v11  ;;  %v269_v14 = vsel %vm267_vm5, %v262_v10, %v264_v12 }
  0xce   : > { %v476_v15 = vpack.c.bf16 %v295_v13, %v269_v14 }
  0xd0   : > { %v286_v16 = vpop.permute.xlu1 %285  ;;  %v260_v17 = vpop.permute.xlu0 %259  ;;  %495 = vmatprep.subr.bf16.mxu0 %v476_v15 }
  0xd1   : > { %v294_v18 = vsel %vm293_vm4, %v286_v16, %v288_v9  ;;  %v268_v19 = vsel %vm267_vm5, %v260_v17, %v262_v10  ;;  %v2358_v10 = vmov 1.0   ;;  %v459_v16 = vld [vmem:[#allocation4 + $0x70] sm:$0xff] }
  0xd2   : > { %v475_v20 = vpack.c.bf16 %v294_v18, %v268_v19  ;;  %v490_v17 = vld [vmem:[#allocation8] sm:$0xf] }
  0xd4   : > { %v316_v21 = vpop.permute.xlu1 %315  ;;  %v314_v22 = vpop.permute.xlu0 %313  ;;  %496 = vmatpush1.bf16.msra.mxu0 %v475_v20 }
  0xd5   : > { %v321_v25 = vsel %vm319_vm6, %v314_v22, %v316_v21 }
  0xd8   : > { %v342_v23 = vpop.permute.xlu1 %341  ;;  %v340_v24 = vpop.permute.xlu0 %339 }
  0xd9   : > { %v347_v26 = vsel %vm345_vm7, %v340_v24, %v342_v23 }
  0xda   : > { %v479_v27 = vpack.c.bf16 %v347_v26, %v321_v25  ;;  %v177_v25 = vand.u32 127, %v176_v5 }
  0xdc   : > { %v338_v28 = vpop.permute.xlu1 %337  ;;  %v312_v29 = vpop.permute.xlu0 %311  ;;  %497 = vmatprep.subr.bf16.mxu0 %v479_v27  ;;  %v179_v26 = vadd.s32 256, %v177_v25 }
  0xdd   : > { %v346_v30 = vsel %vm345_vm7, %v338_v28, %v340_v24  ;;  %v320_v31 = vsel %vm319_vm6, %v312_v29, %v314_v22  ;;  %v2659_v22 = vld [vmem:[#allocation4 + $0xe8] sm:$0xff] }
  0xde   : > { %v478_v32 = vpack.c.bf16 %v346_v30, %v320_v31  ;;  %v2668_v27 = vmul.u32.u64.low 3817748708, %v179_v26  ;;  %v2669_v28 = vmul.u32.u64.high 3817748708, %v179_v26, %v2668_v27 }
  0xe0   : > { %v372_v33 = vpop.permute.xlu1 %371  ;;  %v370_v34 = vpop.permute.xlu0 %369  ;;  %498 = vmatpush1.bf16.msra.mxu0 %v478_v32  ;;  %v208_v29 = vshrl.u32 %v2669_v28, 4 }
  0xe1   : > { %381 = vst.msk [vmem:[#allocation4 + $0x88] sm:$0xff] %vm249_vm0, %v372_v33  ;;  %v375_v35 = vsel %vm373_vm8, %v370_v34, %v372_v33 }
  0xe2   : > { %v482_v36 = vpack.c.bf16 %v375_v35, %v2533_v1  ;;  %v209_v30 = vmul.u32 18, %v208_v29  ;;  %v178_v35 = vadd.s32 128, %v177_v25 }
  0xe4   : > { %v266_v37 = vpop.permute.xlu1 %265  ;;  %v368_v38 = vpop.permute.xlu0 %367  ;;  %499 = vmatprep.subr.bf16.mxu0 %v482_v36  ;;  %v210_v31 = vsub.s32 %v179_v26, %v209_v30 }
  0xe5   : > { %v270_v39 = vsel %vm267_vm5, %v264_v12, %v266_v37  ;;  %v374_v40 = vsel %vm373_vm8, %v368_v38, %v370_v34  ;;  %v2672_v33 = vmul.u32.u64.low 3817748708, %v177_v25  ;;  %v2673_v34 = vmul.u32.u64.high 3817748708, %v177_v25, %v2672_v33 }
  0xe6   : > { %276 = vst.msk [vmem:[#allocation4 + $0x10] sm:$0xff] %vm249_vm0, %v270_v39  ;;  %v481_v41 = vpack.c.bf16 %v374_v40, %v2526_v0  ;;  %vm215_vm15 = vcmp.ne.s32.totalorder %v210_v31, 0  ;;  %vm218_vm1 = vcmp.lt.s32.totalorder %v210_v31, 0  ;;  %v224_v39 = vadd.s32 18, %v210_v31 }
  0xe7   : > { %v2675_v5 = vmul.u32.u64.low 3817748708, %v178_v35  ;;  %v2676_v40 = vmul.u32.u64.high 3817748708, %v178_v35, %v2675_v5  ;;  %vm221_vm3 = vmand %vm218_vm1, %vm215_vm15 }
  0xe8   : > { %v391_v42 = vpop.permute.xlu1 %390  ;;  %v292_v43 = vpop.permute.xlu0 %291  ;;  %500 = vmatpush1.bf16.msra.mxu0 %v481_v41  ;;  %v462_v6 = vld [vmem:[#allocation4 + $0x88] sm:$0xff]  ;;  %v227_v41 = vsel %vm221_vm3, %v224_v39, %v210_v31 }
  0xe9   : > { %v296_v44 = vsel %vm293_vm4, %v290_v11, %v292_v43  ;;  %v483_v18 = vpack.c.bf16 %v462_v6, %v459_v16  ;;  %vm230_vm12 = vcmp.lt.s32.totalorder %v227_v41, 16 }
  0xea   : > { %302 = vst.msk [vmem:[#allocation4 + $0x28] sm:$0xff] %vm249_vm0, %v296_v44  ;;  %v197_v44 = vshrl.u32 %v2676_v40, 4 }
  0xec   : > { %v412_v45 = vpop.permute.xlu1 %411  ;;  %v393_v46 = vpop.permute.xlu0 %392 }
  0xed   : > { %402 = vst.msk [vmem:[#allocation4 + $0xa0] sm:$0xff] %vm249_vm0, %v393_v46  ;;  %v396_v49 = vsel %vm394_vm9, %v391_v42, %v393_v46  ;;  %v447_v51 = vld [vmem:[#allocation4 + $0x10] sm:$0xff] }
  0xf0   : > { %v389_v47 = vpop.permute.xlu1 %388  ;;  %v414_v48 = vpop.permute.xlu0 %413 }
  0xf1   : > { %v417_v50 = vsel %vm415_vm10, %v412_v45, %v414_v48  ;;  %423 = vst.msk [vmem:[#allocation4 + $0xb8] sm:$0xff] %vm249_vm0, %v414_v48  ;;  %v450_v52 = vld [vmem:[#allocation4 + $0x28] sm:$0xff]  ;;  %v395_v57 = vsel %vm394_vm9, %v389_v47, %v391_v42  ;;  %v186_v42 = vshrl.u32 %v2673_v34, 4 }
  0xf2   : > { %v477_v53 = vpack.c.bf16 %v450_v52, %v447_v51  ;;  %v485_v54 = vpack.c.bf16 %v417_v50, %v396_v49  ;;  %v198_v51 = vmul.u32 18, %v197_v44 }
  0xf3   : > { %v187_v43 = vmul.u32 18, %v186_v42 }
  0xf4   : > { %v318_v55 = vpop.permute.xlu1 %317  ;;  %2046 = vmatpush3.bf16.msra.mxu1 %v477_v53  ;;  %v410_v56 = vpop.permute.xlu0 %409  ;;  %501 = vmatprep.subr.bf16.mxu0 %v485_v54  ;;  %v465_v20 = vld [vmem:[#allocation4 + $0xa0] sm:$0xff]  ;;  %v199_v54 = vsub.s32 %v178_v35, %v198_v51 }
  0xf5   : > { %v322_v58 = vsel %vm319_vm6, %v316_v21, %v318_v55  ;;  %v416_v59 = vsel %vm415_vm10, %v410_v56, %v412_v45  ;;  %2047 = vmatprep.subr.bf16.mxu1 %v2351_v4  ;;  %v2681_v45 = vsel %vm230_vm12, 1.0, %v2351_v4  ;;  %v188_v50 = vsub.s32 %v177_v25, %v187_v43 }
  0xf6   : > { %328 = vst.msk [vmem:[#allocation4 + $0x40] sm:$0xff] %vm249_vm0, %v322_v58  ;;  %v484_v60 = vpack.c.bf16 %v416_v59, %v395_v57  ;;  %v223_v58 = vadd.s32 18, %v199_v54 }
  0xf7   : > { %vm213_vm15 = vcmp.ne.s32.totalorder %v188_v50, 0  ;;  %vm216_vm1 = vcmp.lt.s32.totalorder %v188_v50, 0  ;;  %v222_v55 = vadd.s32 18, %v188_v50 }
  0xf8   : > { %v344_v61 = vpop.permute.xlu0 %343  ;;  %502 = vmatpush1.bf16.msra.mxu0 %v484_v60  ;;  %v433_v62 = vpop.permute.xlu1 %432  ;;  %v468_v19 = vld [vmem:[#allocation4 + $0xb8] sm:$0xff]  ;;  %vm219_vm3 = vmand %vm216_vm1, %vm213_vm15 }
  0xf9   : > { %v348_v63 = vsel %vm345_vm7, %v342_v23, %v344_v61  ;;  %v486_v23 = vpack.c.bf16 %v468_v19, %v465_v20  ;;  %v225_v57 = vsel %vm219_vm3, %v222_v55, %v188_v50  ;;  %vm3190_vm3 = vmmov 0  }
  0xfa   : > { %354 = vst.msk [vmem:[#allocation4 + $0x58] sm:$0xff] %vm249_vm0, %v348_v63 }
  0xfc   : > { %v435_v0 = vpop.permute.xlu0 %434  ;;  %v431_v1 = vpop.permute.xlu1 %430 }
  0xfd   : > { %v438_v2 = vsel %vm3172_vm11, %v433_v62, %v435_v0  ;;  %444 = vst.msk [vmem:[#allocation4 + $0xd0] sm:$0xff] %vm249_vm0, %v435_v0  ;;  %v437_v7 = vsel %vm3172_vm11, %v431_v1, %v433_v62  ;;  %v453_v12 = vld [vmem:[#allocation4 + $0x40] sm:$0xff]  ;;  %vm228_vm11 = vcmp.lt.s32.totalorder %v225_v57, 16 }
  0xfe   : > { %v2195_v11 = vpack.c.bf16 %v2358_v10, %v438_v2  ;;  %v2198_v14 = vpack.c.bf16 %v2358_v10, %v437_v7  ;;  %v2691_v61 = vsel %vm228_vm11, 1.0, %v2351_v4 }
 0x100   : > { %2196 = vmatprep.subr.msk.bf16.mxu0 %vm2645_vm13, %v2195_v11  ;;  %v619_v2 = vpop.permute.xlu1 %618  ;;  %v594_v7 = vpop.permute.xlu0 %593 }
 0x101   : > { %v456_v13 = vld [vmem:[#allocation4 + $0x58] sm:$0xff]  ;;  %2199 = vmatpush1.bf16.msk.msra.mxu0 %vm2645_vm13, %v2198_v14 }
 0x102   : > { %v480_v15 = vpack.c.bf16 %v456_v13, %v453_v12 }
 0x104   : > { %2048 = vmatpush3.bf16.msra.mxu1 %v480_v15  ;;  %2001 = vmatmul.mubr.msk.bf16.vlgmr.msra.gmra.mrb[0].mxu0 %vm3171_vm14, %v490_v17  ;;  %v471_v21 = vld [vmem:[#allocation4 + $0xd0] sm:$0xff]  ;;  %v669_v11 = vpop.permute.xlu1 %668  ;;  %v644_v12 = vpop.permute.xlu0 %643 }
 0x105   : > { %2049 = vmatprep.subr.bf16.mxu1 %v2351_v4  ;;  %853 = vmatprep.mubr.bf16.mxu0 %v2356_v8  ;;  %v489_v24 = vpack.c.bf16 %v2659_v22, %v471_v21 }
 0x108   : > { %2050 = vmatpush3.bf16.msra.mxu1 %v483_v18 }
 0x109   : > { %2051 = vmatprep.subr.bf16.mxu1 %v2351_v4 }
 0x10c   : > { %2052 = vmatpush3.bf16.msra.mxu1 %v486_v23 }
 0x10d   : > { %2053 = vmatprep.subr.bf16.mxu1 %v2351_v4 }
 0x110   : > { %2054 = vmatpush3.bf16.msra.mxu1 %v489_v24 }
 0x111   : > { %2059 = vmatprep.subr.bf16.mxu1 %v2351_v4 }
 0x113   : > { %2056 = vmatmul.mubr.msk.bf16.vlgmr.msra.gmra.mrb[0].mxu1 %vm3171_vm14, %v490_v17  ;;  %vm217_vm14 = vcmp.lt.s32.totalorder %v199_v54, 0 }
 0x114   : > { %2069 = vmatprep.mubr.msk.bf16.mxu1 %vm3169_vm2, %v2351_v4  ;;  %vm214_vm2 = vcmp.ne.s32.totalorder %v199_v54, 0 }
 0x115   : > { %vm220_vm12 = vmand %vm217_vm14, %vm214_vm2  ;;  %vm3186_vm2 = vcmask 891904   ;;  %vm3188_vm14 = vcmask 654336  }
 0x116   : > { %v226_v59 = vsel %vm220_vm12, %v223_v58, %v199_v54  ;;  %vm3187_vm11 = vmmov %vm3186_vm2 }
 0x117   : > { %vm229_vm15 = vcmp.lt.s32.totalorder %v226_v59, 16  ;;  %vm3189_vm1 = vmmov %vm3188_vm14 }
 0x118   : > { %v2699_v0 = vsel %vm229_vm15, 1.0, %v2351_v4  ;;  %vm3191_vm12 = vmmov %vm3186_vm2 }
 0x119   : > { %vm3192_vm15 = vmmov %vm3186_vm2 }
 0x1d7   : > { %v529_v32 = vpop.f32.mrb[0].mxu0 }
 0x1d8   : > { %v531_v36 = vpop.f32.mrb[1].mxu0  ;;  %v576_v60 = vmax.f32 %v529_v32, 0.0 }
 0x1d9   : > { %v533_v37 = vpop.f32.mrb[2].mxu0  ;;  %v577_v63 = vmax.f32 %v531_v36, 0.0 }
 0x1da   : > { %v534_v38 = vpop.f32.mrb[3].mxu0  ;;  %v2694_v62 = vmul.f32 %v2691_v61, %v576_v60 }
 0x1db   : > { %v2702_v1 = vmul.f32 %v2699_v0, %v577_v63 }
 0x1e6   : > { %v570_v46 = vpop.f32.mrb[0].mxu1 }
 0x1e7   : > { %v578_v47 = vmax.f32 %v570_v46, 0.0  ;;  %v2057_v48 = vpop.f32.mrb[1].mxu1 }
 0x1e8   : > { %v573_v49 = vpop.f32.mrb[2].mxu1 }
 0x1e9   : > { %v581_v52 = vmul.f32 %v2681_v45, %v578_v47  ;;  %v2058_v53 = vpop.f32.mrb[3].mxu1 }
 0x1eb   : > { %584 = vst.msk [vmem:[#allocation3 + $0x18] sm:$0xff] %vm249_vm0, %v581_v52 }
 0x1f2   : > { %v687_v56 = vld [vmem:[#allocation3 + $0x18] sm:$0xff] }
 0x1f3   : > { %690 = vst.msk [vmem:[#allocation4 + $0x70] sm:$0xff] %vm249_vm0, %v687_v56  ;;  %624 = vrot.lane.b32.xlu1 %v687_v56, %s2346_s17  ;;  %599 = vrot.lane.b32.xlu0 %v687_v56, %s2347_s27 }
 0x1f7   : > { %701 = vrot.lane.b32.xlu1 %v687_v56, %s2350_s23  ;;  %674 = vrot.lane.b32.xlu0 %v687_v56, %s2349_s22 }
 0x1fb   : > { %649 = vrot.lane.b32.xlu1 %v687_v56, %s2348_s15  ;;  %721 = vrot.lane.b32.xlu0 %v687_v56, %s2352_s28 }
 0x1ff   : > { %717 = vrot.lane.b32.xlu1 %v2694_v62, %s2352_s28  ;;  %741 = vrot.lane.b32.xlu0 %v687_v56, %s2353_s30 }
 0x203   : > { %597 = vrot.lane.b32.xlu1 %v2702_v1, %s2347_s27  ;;  %595 = vrot.lane.b32.xlu0 %v2694_v62, %s2347_s27 }
 0x207   : > { %622 = vrot.lane.b32.xlu1 %v2702_v1, %s2346_s17  ;;  %620 = vrot.lane.b32.xlu0 %v2694_v62, %s2346_s17 }
 0x20b   : > { %647 = vrot.lane.b32.xlu1 %v2702_v1, %s2348_s15  ;;  %645 = vrot.lane.b32.xlu0 %v2694_v62, %s2348_s15 }
 0x20f   : > { %672 = vrot.lane.b32.xlu1 %v2702_v1, %s2349_s22  ;;  %670 = vrot.lane.b32.xlu0 %v2694_v62, %s2349_s22 }
 0x213   : > { %719 = vrot.lane.b32.xlu1 %v2702_v1, %s2352_s28  ;;  %697 = vrot.lane.b32.xlu0 %v2694_v62, %s2350_s23 }
 0x217   : > { %739 = vrot.lane.b32.xlu1 %v2702_v1, %s2353_s30  ;;  %699 = vrot.lane.b32.xlu0 %v2702_v1, %s2350_s23 }
 0x21b   : > { %759 = vrot.lane.b32.xlu1 %v2702_v1, %s2354_s3  ;;  %737 = vrot.lane.b32.xlu0 %v2694_v62, %s2353_s30 }
 0x21f   : > { %757 = vrot.lane.b32.xlu1 %v2694_v62, %s2354_s3  ;;  %761 = vrot.lane.b32.xlu0 %v687_v56, %s2354_s3 }
 0x223   : > { %947 = vrot.lane.b32.xlu1 %v2351_v4, %s2346_s17  ;;  %922 = vrot.lane.b32.xlu0 %v2351_v4, %s2347_s27 }
 0x227   : > { %997 = vrot.lane.b32.xlu1 %v2351_v4, %s2349_s22  ;;  %972 = vrot.lane.b32.xlu0 %v2351_v4, %s2348_s15 }
 0x265   : > { %v625_v13 = vpop.permute.xlu1 %624  ;;  %v600_v14 = vpop.permute.xlu0 %599 }
 0x269   : > { %v702_v15 = vpop.permute.xlu1 %701  ;;  %v675_v16 = vpop.permute.xlu0 %674 }
 0x26a   : > { %710 = vst.msk [vmem:[#allocation4 + $0x88] sm:$0xff] %vm249_vm0, %v702_v15 }
 0x26d   : > { %v650_v6 = vpop.permute.xlu1 %649  ;;  %v722_v17 = vpop.permute.xlu0 %721 }
 0x26e   : > { %730 = vst.msk [vmem:[#allocation4 + $0xa0] sm:$0xff] %vm249_vm0, %v722_v17 }
 0x271   : > { %v718_v18 = vpop.permute.xlu1 %717  ;;  %v742_v19 = vpop.permute.xlu0 %741  ;;  %v788_v63 = vld [vmem:[#allocation4 + $0x88] sm:$0xff] }
 0x272   : > { %750 = vst.msk [vmem:[#allocation4 + $0xb8] sm:$0xff] %vm249_vm0, %v742_v19 }
 0x275   : > { %v598_v20 = vpop.permute.xlu1 %597  ;;  %v596_v21 = vpop.permute.xlu0 %595 }
 0x276   : > { %v603_v23 = vsel %vm267_vm5, %v598_v20, %v600_v14  ;;  %v601_v24 = vsel %vm267_vm5, %v594_v7, %v596_v21  ;;  %v602_v27 = vsel %vm267_vm5, %v596_v21, %v598_v20  ;;  %v785_v14 = vld [vmem:[#allocation4 + $0x70] sm:$0xff] }
 0x277   : > { %609 = vst.msk [vmem:[#allocation4 + $0x10] sm:$0xff] %vm249_vm0, %v603_v23 }
 0x279   : > { %v623_v25 = vpop.permute.xlu1 %622  ;;  %v621_v26 = vpop.permute.xlu0 %620 }
 0x27a   : > { %v628_v28 = vsel %vm293_vm4, %v623_v25, %v625_v13  ;;  %v626_v29 = vsel %vm293_vm4, %v619_v2, %v621_v26  ;;  %v627_v30 = vsel %vm293_vm4, %v621_v26, %v623_v25 }
 0x27b   : > { %634 = vst.msk [vmem:[#allocation4 + $0x28] sm:$0xff] %vm249_vm0, %v628_v28  ;;  %v802_v31 = vpack.c.bf16 %v627_v30, %v602_v27  ;;  %v801_v32 = vpack.c.bf16 %v626_v29, %v601_v24  ;;  %v817_v24 = vld [vmem:[#allocation8 + $0x4] sm:$0xf] }
 0x27d   : > { %v648_v33 = vpop.permute.xlu1 %647  ;;  %v646_v34 = vpop.permute.xlu0 %645  ;;  %821 = vmatprep.subr.bf16.mxu0 %v802_v31 }
 0x27e   : > { %v653_v35 = vsel %vm319_vm6, %v648_v33, %v650_v6  ;;  %822 = vmatpush1.bf16.msra.mxu0 %v801_v32  ;;  %v651_v36 = vsel %vm319_vm6, %v644_v12, %v646_v34  ;;  %v652_v39 = vsel %vm319_vm6, %v646_v34, %v648_v33  ;;  %v773_v42 = vld [vmem:[#allocation4 + $0x10] sm:$0xff] }
 0x27f   : > { %659 = vst.msk [vmem:[#allocation4 + $0x40] sm:$0xff] %vm249_vm0, %v653_v35 }
 0x281   : > { %v673_v37 = vpop.permute.xlu1 %672  ;;  %v671_v38 = vpop.permute.xlu0 %670 }
 0x282   : > { %v678_v5 = vsel %vm345_vm7, %v673_v37, %v675_v16  ;;  %v676_v40 = vsel %vm345_vm7, %v669_v11, %v671_v38  ;;  %v677_v41 = vsel %vm345_vm7, %v671_v38, %v673_v37  ;;  %v776_v43 = vld [vmem:[#allocation4 + $0x28] sm:$0xff] }
 0x283   : > { %684 = vst.msk [vmem:[#allocation4 + $0x58] sm:$0xff] %vm249_vm0, %v678_v5  ;;  %v803_v44 = vpack.c.bf16 %v776_v43, %v773_v42  ;;  %v805_v46 = vpack.c.bf16 %v677_v41, %v652_v39  ;;  %v804_v47 = vpack.c.bf16 %v676_v40, %v651_v36  ;;  %v903_v40 = vld [vmem:[%s2515_s29 + $0x10] sm:$0xff] }
 0x285   : > { %v720_v48 = vpop.permute.xlu1 %719  ;;  %2060 = vmatpush3.bf16.msra.mxu1 %v803_v44  ;;  %v698_v49 = vpop.permute.xlu0 %697  ;;  %823 = vmatprep.subr.bf16.mxu0 %v805_v46 }
 0x286   : > { %2061 = vmatprep.subr.bf16.mxu1 %v2351_v4  ;;  %824 = vmatpush1.bf16.msra.mxu0 %v804_v47  ;;  %v779_v55 = vld [vmem:[#allocation4 + $0x40] sm:$0xff]  ;;  %v724_v60 = vsel %vm394_vm9, %v720_v48, %v722_v17  ;;  %v723_v12 = vsel %vm394_vm9, %v718_v18, %v720_v48 }
 0x287   : > { %v791_v18 = vld [vmem:[#allocation4 + $0xa0] sm:$0xff] }
 0x289   : > { %v740_v50 = vpop.permute.xlu1 %739  ;;  %v700_v51 = vpop.permute.xlu0 %699 }
 0x28a   : > { %v744_v52 = vsel %vm415_vm10, %v740_v50, %v742_v19  ;;  %v703_v53 = vsel %vm373_vm8, %v698_v49, %v700_v51  ;;  %v704_v54 = vsel %vm373_vm8, %v700_v51, %v702_v15  ;;  %v782_v56 = vld [vmem:[#allocation4 + $0x58] sm:$0xff]  ;;  %v809_v15 = vpack.c.bf16 %v788_v63, %v785_v14 }
 0x28b   : > { %v806_v57 = vpack.c.bf16 %v782_v56, %v779_v55  ;;  %v808_v58 = vpack.c.bf16 %v704_v54, %v2702_v1  ;;  %v807_v59 = vpack.c.bf16 %v703_v53, %v2694_v62  ;;  %v811_v11 = vpack.c.bf16 %v744_v52, %v724_v60  ;;  %v794_v62 = vld [vmem:[#allocation4 + $0xb8] sm:$0xff] }
 0x28c   : > { %v812_v20 = vpack.c.bf16 %v794_v62, %v791_v18 }
 0x28d   : > { %v760_v2 = vpop.permute.xlu1 %759  ;;  %2062 = vmatpush3.bf16.msra.mxu1 %v806_v57  ;;  %v738_v7 = vpop.permute.xlu0 %737  ;;  %825 = vmatprep.subr.bf16.mxu0 %v808_v58 }
 0x28e   : > { %v743_v13 = vsel %vm415_vm10, %v738_v7, %v740_v50  ;;  %2063 = vmatprep.subr.bf16.mxu1 %v2351_v4  ;;  %826 = vmatpush1.bf16.msra.mxu0 %v807_v59 }
 0x28f   : > { %827 = vmatprep.subr.bf16.mxu0 %v811_v11  ;;  %v810_v1 = vpack.c.bf16 %v743_v13, %v723_v12 }
 0x291   : > { %v758_v16 = vpop.permute.xlu1 %757  ;;  %2064 = vmatpush3.bf16.msra.mxu1 %v809_v15  ;;  %v762_v6 = vpop.permute.xlu0 %761 }
 0x292   : > { %v763_v17 = vsel %vm3186_vm2, %v758_v16, %v760_v2  ;;  %v764_v19 = vsel %vm3187_vm11, %v760_v2, %v762_v6  ;;  %770 = vst.msk [vmem:[#allocation4 + $0xd0] sm:$0xff] %vm249_vm0, %v762_v6  ;;  %2065 = vmatprep.subr.bf16.mxu1 %v2351_v4  ;;  %828 = vmatpush1.bf16.msra.mxu0 %v810_v1  ;;  %vm3193_vm2 = vmmov %vm3189_vm1 }
 0x293   : > { %v2201_v21 = vpack.c.bf16 %v2358_v10, %v764_v19  ;;  %v2204_v23 = vpack.c.bf16 %v2358_v10, %v763_v17  ;;  %vm3194_vm11 = vmmov %vm3189_vm1 }
 0x295   : > { %2066 = vmatpush3.bf16.msra.mxu1 %v812_v20  ;;  %2202 = vmatprep.subr.msk.bf16.mxu0 %vm2645_vm13, %v2201_v21  ;;  %v948_v42 = vpop.permute.xlu1 %947  ;;  %v923_v43 = vpop.permute.xlu0 %922 }
 0x296   : > { %2067 = vmatprep.subr.bf16.mxu1 %v2351_v4  ;;  %2205 = vmatpush1.bf16.msk.msra.mxu0 %vm2645_vm13, %v2204_v23 }
 0x299   : > { %v797_v25 = vld [vmem:[#allocation4 + $0xd0] sm:$0xff]  ;;  %2003 = vmatmul.mubr.msk.bf16.vlgmr.msra.gmra.mrb[4].mxu0 %vm3188_vm14, %v817_v24  ;;  %v998_v44 = vpop.permute.xlu1 %997  ;;  %v973_v46 = vpop.permute.xlu0 %972  ;;  %vm3196_vm14 = vmmov %vm3191_vm12 }
 0x29a   : > { %v815_v26 = vpack.c.bf16 %v2659_v22, %v797_v25  ;;  %1182 = vmatprep.mubr.bf16.mxu0 %v2356_v8 }
 0x29c   : > { %2068 = vmatpush3.bf16.msra.mxu1 %v815_v26 }
 0x29d   : > { %2073 = vmatprep.subr.bf16.mxu1 %v2351_v4 }
 0x29f   : > { %2070 = vmatmul.mubr.msk.bf16.vlgmr.msra.gmra.mrb[4].mxu1 %vm3189_vm1, %v817_v24 }
 0x2a0   : > { %2083 = vmatprep.mubr.msk.bf16.mxu1 %vm3190_vm3, %v2351_v4 }
 0x36c   : > { %v855_v27 = vpop.f32.mrb[4].mxu0 }
 0x36d   : > { %v857_v28 = vpop.f32.mrb[5].mxu0  ;;  %v905_v38 = vmul.f32 %v2691_v61, %v855_v27 }
 0x36e   : > { %v859_v29 = vpop.f32.mrb[6].mxu0  ;;  %v906_v5 = vmul.f32 %v2699_v0, %v857_v28 }
 0x36f   : > { %v860_v30 = vpop.f32.mrb[7].mxu0 }
 0x370   : > { %v2818_v41 = vadd.f32 %v906_v5, %v903_v40 }
 0x372   : > { %v896_v31 = vpop.f32.mrb[4].mxu1 }
 0x373   : > { %v907_v32 = vmul.f32 %v2681_v45, %v896_v31  ;;  %v2071_v33 = vpop.f32.mrb[5].mxu1 }
 0x374   : > { %v899_v34 = vpop.f32.mrb[6].mxu1 }
 0x375   : > { %v910_v35 = vadd.f32 %v907_v32, %v2541_v3  ;;  %v2072_v36 = vpop.f32.mrb[7].mxu1  ;;  %v902_v3 = vld [vmem:[%s2515_s29 + $0x8] sm:$0xff] }
 0x376   : > { %v2810_v39 = vadd.f32 %v905_v38, %v902_v3 }
 0x377   : > { %913 = vst.msk [vmem:[#allocation2 + $0x18] sm:$0xff] %vm249_vm0, %v910_v35 }
 0x37e   : > { %v2796_v37 = vld [vmem:[#allocation2 + $0x18] sm:$0xff] }
 0x37f   : > { %1019 = vst.msk [vmem:[#allocation4 + $0x70] sm:$0xff] %vm249_vm0, %v2796_v37  ;;  %953 = vrot.lane.b32.xlu1 %v2796_v37, %s2346_s17  ;;  %928 = vrot.lane.b32.xlu0 %v2796_v37, %s2347_s27 }
 0x383   : > { %1030 = vrot.lane.b32.xlu1 %v2796_v37, %s2350_s23  ;;  %1003 = vrot.lane.b32.xlu0 %v2796_v37, %s2349_s22 }
 0x387   : > { %978 = vrot.lane.b32.xlu1 %v2796_v37, %s2348_s15  ;;  %1050 = vrot.lane.b32.xlu0 %v2796_v37, %s2352_s28 }
 0x38b   : > { %1046 = vrot.lane.b32.xlu1 %v2810_v39, %s2352_s28  ;;  %1070 = vrot.lane.b32.xlu0 %v2796_v37, %s2353_s30 }
 0x38f   : > { %926 = vrot.lane.b32.xlu1 %v2818_v41, %s2347_s27  ;;  %924 = vrot.lane.b32.xlu0 %v2810_v39, %s2347_s27 }
 0x393   : > { %951 = vrot.lane.b32.xlu1 %v2818_v41, %s2346_s17  ;;  %949 = vrot.lane.b32.xlu0 %v2810_v39, %s2346_s17 }
 0x397   : > { %976 = vrot.lane.b32.xlu1 %v2818_v41, %s2348_s15  ;;  %974 = vrot.lane.b32.xlu0 %v2810_v39, %s2348_s15 }
 0x39b   : > { %1001 = vrot.lane.b32.xlu1 %v2818_v41, %s2349_s22  ;;  %999 = vrot.lane.b32.xlu0 %v2810_v39, %s2349_s22 }
 0x39f   : > { %1048 = vrot.lane.b32.xlu1 %v2818_v41, %s2352_s28  ;;  %1026 = vrot.lane.b32.xlu0 %v2810_v39, %s2350_s23 }
 0x3a3   : > { %1068 = vrot.lane.b32.xlu1 %v2818_v41, %s2353_s30  ;;  %1028 = vrot.lane.b32.xlu0 %v2818_v41, %s2350_s23 }
 0x3a7   : > { %1088 = vrot.lane.b32.xlu1 %v2818_v41, %s2354_s3  ;;  %1066 = vrot.lane.b32.xlu0 %v2810_v39, %s2353_s30 }
 0x3ab   : > { %1086 = vrot.lane.b32.xlu1 %v2810_v39, %s2354_s3  ;;  %1090 = vrot.lane.b32.xlu0 %v2796_v37, %s2354_s3 }
 0x3af   : > { %1273 = vrot.lane.b32.xlu1 %v2351_v4, %s2346_s17  ;;  %1248 = vrot.lane.b32.xlu0 %v2351_v4, %s2347_s27 }
 0x3b3   : > { %1323 = vrot.lane.b32.xlu1 %v2351_v4, %s2349_s22  ;;  %1298 = vrot.lane.b32.xlu0 %v2351_v4, %s2348_s15 }
 0x3f1   : > { %v954_v47 = vpop.permute.xlu1 %953  ;;  %v929_v48 = vpop.permute.xlu0 %928 }
 0x3f5   : > { %v1031_v49 = vpop.permute.xlu1 %1030  ;;  %v1004_v50 = vpop.permute.xlu0 %1003 }
 0x3f6   : > { %1039 = vst.msk [vmem:[#allocation4 + $0x88] sm:$0xff] %vm249_vm0, %v1031_v49 }
 0x3f9   : > { %v979_v51 = vpop.permute.xlu1 %978  ;;  %v1051_v52 = vpop.permute.xlu0 %1050 }
 0x3fa   : > { %1059 = vst.msk [vmem:[#allocation4 + $0xa0] sm:$0xff] %vm249_vm0, %v1051_v52 }
 0x3fd   : > { %v1047_v53 = vpop.permute.xlu1 %1046  ;;  %v1071_v54 = vpop.permute.xlu0 %1070  ;;  %v1117_v40 = vld [vmem:[#allocation4 + $0x88] sm:$0xff] }
 0x3fe   : > { %1079 = vst.msk [vmem:[#allocation4 + $0xb8] sm:$0xff] %vm249_vm0, %v1071_v54 }
 0x401   : > { %v927_v55 = vpop.permute.xlu1 %926  ;;  %v925_v56 = vpop.permute.xlu0 %924 }
 0x402   : > { %v932_v57 = vsel %vm267_vm5, %v927_v55, %v929_v48  ;;  %v930_v58 = vsel %vm267_vm5, %v923_v43, %v925_v56  ;;  %v931_v63 = vsel %vm267_vm5, %v925_v56, %v927_v55  ;;  %v1114_v48 = vld [vmem:[#allocation4 + $0x70] sm:$0xff] }
 0x403   : > { %938 = vst.msk [vmem:[#allocation4 + $0x10] sm:$0xff] %vm249_vm0, %v932_v57 }
 0x405   : > { %v952_v59 = vpop.permute.xlu1 %951  ;;  %v950_v60 = vpop.permute.xlu0 %949 }
 0x406   : > { %v957_v2 = vsel %vm293_vm4, %v952_v59, %v954_v47  ;;  %v955_v7 = vsel %vm293_vm4, %v948_v42, %v950_v60  ;;  %v956_v11 = vsel %vm293_vm4, %v950_v60, %v952_v59  ;;  %v1146_v60 = vld [vmem:[#allocation8 + $0x8] sm:$0xf] }
 0x407   : > { %963 = vst.msk [vmem:[#allocation4 + $0x28] sm:$0xff] %vm249_vm0, %v957_v2  ;;  %v1131_v12 = vpack.c.bf16 %v956_v11, %v931_v63  ;;  %v1130_v13 = vpack.c.bf16 %v955_v7, %v930_v58 }
 0x409   : > { %v977_v14 = vpop.permute.xlu1 %976  ;;  %v975_v15 = vpop.permute.xlu0 %974  ;;  %1150 = vmatprep.subr.bf16.mxu0 %v1131_v12 }
 0x40a   : > { %v982_v1 = vsel %vm319_vm6, %v977_v14, %v979_v51  ;;  %1151 = vmatpush1.bf16.msra.mxu0 %v1130_v13  ;;  %v980_v62 = vsel %vm319_vm6, %v973_v46, %v975_v15  ;;  %v981_v17 = vsel %vm319_vm6, %v975_v15, %v977_v14  ;;  %v1102_v21 = vld [vmem:[#allocation4 + $0x10] sm:$0xff]  ;;  %v1123_v51 = vld [vmem:[#allocation4 + $0xb8] sm:$0xff] }
 0x40b   : > { %988 = vst.msk [vmem:[#allocation4 + $0x40] sm:$0xff] %vm249_vm0, %v982_v1 }
 0x40d   : > { %v1002_v16 = vpop.permute.xlu1 %1001  ;;  %v1000_v6 = vpop.permute.xlu0 %999 }
 0x40e   : > { %v1007_v19 = vsel %vm345_vm7, %v1002_v16, %v1004_v50  ;;  %v1005_v18 = vsel %vm345_vm7, %v998_v44, %v1000_v6  ;;  %v1006_v20 = vsel %vm345_vm7, %v1000_v6, %v1002_v16  ;;  %v1105_v23 = vld [vmem:[#allocation4 + $0x28] sm:$0xff] }
 0x40f   : > { %1013 = vst.msk [vmem:[#allocation4 + $0x58] sm:$0xff] %vm249_vm0, %v1007_v19  ;;  %v1132_v24 = vpack.c.bf16 %v1105_v23, %v1102_v21  ;;  %v1134_v25 = vpack.c.bf16 %v1006_v20, %v981_v17  ;;  %v1133_v26 = vpack.c.bf16 %v1005_v18, %v980_v62  ;;  %v2960_v19 = vld [vmem:[#allocation2] sm:$0xff] }
 0x411   : > { %v1049_v27 = vpop.permute.xlu1 %1048  ;;  %2074 = vmatpush3.bf16.msra.mxu1 %v1132_v24  ;;  %v1027_v28 = vpop.permute.xlu0 %1026  ;;  %1152 = vmatprep.subr.bf16.mxu0 %v1134_v25 }
 0x412   : > { %2075 = vmatprep.subr.bf16.mxu1 %v2351_v4  ;;  %1153 = vmatpush1.bf16.msra.mxu0 %v1133_v26  ;;  %v1108_v34 = vld [vmem:[#allocation4 + $0x40] sm:$0xff]  ;;  %v1053_v5 = vsel %vm394_vm9, %v1049_v27, %v1051_v52  ;;  %v1052_v46 = vsel %vm394_vm9, %v1047_v53, %v1049_v27 }
 0x413   : > { %v1120_v53 = vld [vmem:[#allocation4 + $0xa0] sm:$0xff] }
 0x414   : > { %v1141_v57 = vpack.c.bf16 %v1123_v51, %v1120_v53 }
 0x415   : > { %v1069_v29 = vpop.permute.xlu1 %1068  ;;  %v1029_v30 = vpop.permute.xlu0 %1028 }
 0x416   : > { %v1073_v31 = vsel %vm415_vm10, %v1069_v29, %v1071_v54  ;;  %v1032_v32 = vsel %vm373_vm8, %v1027_v28, %v1029_v30  ;;  %v1033_v33 = vsel %vm373_vm8, %v1029_v30, %v1031_v49  ;;  %v1111_v35 = vld [vmem:[#allocation4 + $0x58] sm:$0xff]  ;;  %v1138_v49 = vpack.c.bf16 %v1117_v40, %v1114_v48 }
 0x417   : > { %v1135_v36 = vpack.c.bf16 %v1111_v35, %v1108_v34  ;;  %v1137_v38 = vpack.c.bf16 %v1033_v33, %v2818_v41  ;;  %v1136_v3 = vpack.c.bf16 %v1032_v32, %v2810_v39  ;;  %v1140_v44 = vpack.c.bf16 %v1073_v31, %v1053_v5 }
 0x419   : > { %v1089_v42 = vpop.permute.xlu1 %1088  ;;  %2076 = vmatpush3.bf16.msra.mxu1 %v1135_v36  ;;  %v1067_v43 = vpop.permute.xlu0 %1066  ;;  %1154 = vmatprep.subr.bf16.mxu0 %v1137_v38 }
 0x41a   : > { %v1072_v47 = vsel %vm415_vm10, %v1067_v43, %v1069_v29  ;;  %2077 = vmatprep.subr.bf16.mxu1 %v2351_v4  ;;  %1155 = vmatpush1.bf16.msra.mxu0 %v1136_v3 }
 0x41b   : > { %1156 = vmatprep.subr.bf16.mxu0 %v1140_v44  ;;  %v1139_v50 = vpack.c.bf16 %v1072_v47, %v1052_v46 }
 0x41d   : > { %v1087_v54 = vpop.permute.xlu1 %1086  ;;  %2078 = vmatpush3.bf16.msra.mxu1 %v1138_v49  ;;  %v1091_v52 = vpop.permute.xlu0 %1090 }
 0x41e   : > { %v1092_v55 = vsel %vm3191_vm12, %v1087_v54, %v1089_v42  ;;  %v1093_v56 = vsel %vm3192_vm15, %v1089_v42, %v1091_v52  ;;  %1099 = vst.msk [vmem:[#allocation4 + $0xd0] sm:$0xff] %vm249_vm0, %v1091_v52  ;;  %2079 = vmatprep.subr.bf16.mxu1 %v2351_v4  ;;  %1157 = vmatpush1.bf16.msra.mxu0 %v1139_v50 }
 0x41f   : > { %v2207_v58 = vpack.c.bf16 %v2358_v10, %v1093_v56  ;;  %v2210_v59 = vpack.c.bf16 %v2358_v10, %v1092_v55 }
 0x421   : > { %2080 = vmatpush3.bf16.msra.mxu1 %v1141_v57  ;;  %2208 = vmatprep.subr.msk.bf16.mxu0 %vm2645_vm13, %v2207_v58  ;;  %v1274_v18 = vpop.permute.xlu1 %1273  ;;  %v1249_v20 = vpop.permute.xlu0 %1248 }
 0x422   : > { %2081 = vmatprep.subr.bf16.mxu1 %v2351_v4  ;;  %2211 = vmatpush1.bf16.msk.msra.mxu0 %vm2645_vm13, %v2210_v59  ;;  %vm3195_vm13 = vmmov %vm3191_vm12 }
 0x423   : > { %vm3197_vm12 = vmmov %vm3189_vm1 }
 0x425   : > { %v1126_v63 = vld [vmem:[#allocation4 + $0xd0] sm:$0xff]  ;;  %2005 = vmatmul.mubr.msk.bf16.vlgmr.msra.gmra.mrb[8].mxu0 %vm3193_vm2, %v1146_v60  ;;  %v1324_v21 = vpop.permute.xlu1 %1323  ;;  %v1299_v23 = vpop.permute.xlu0 %1298 }
 0x426   : > { %v1144_v2 = vpack.c.bf16 %v2659_v22, %v1126_v63  ;;  %1508 = vmatprep.mubr.bf16.mxu0 %v2356_v8 }
 0x428   : > { %2082 = vmatpush3.bf16.msra.mxu1 %v1144_v2 }
 0x429   : > { %2087 = vmatprep.subr.bf16.mxu1 %v2351_v4 }
 0x42b   : > { %2084 = vmatmul.mubr.msk.bf16.vlgmr.msra.gmra.mrb[8].mxu1 %vm3194_vm11, %v1146_v60 }
 0x42c   : > { %2097 = vmatprep.mubr.msk.bf16.mxu1 %vm3190_vm3, %v2351_v4 }
 0x4f8   : > { %v1184_v10 = vpop.f32.mrb[8].mxu0 }
 0x4f9   : > { %v1231_v7 = vmax.f32 %v1184_v10, 0.0  ;;  %v1186_v9 = vpop.f32.mrb[9].mxu0 }
 0x4fa   : > { %v1232_v11 = vmax.f32 %v1186_v9, 0.0  ;;  %v1188_v12 = vpop.f32.mrb[10].mxu0 }
 0x4fb   : > { %v2912_v13 = vmul.f32 %v2691_v61, %v1231_v7  ;;  %v1189_v14 = vpop.f32.mrb[11].mxu0 }
 0x4fc   : > { %v2915_v22 = vmul.f32 %v2699_v0, %v1232_v11 }
 0x4fe   : > { %v1225_v15 = vpop.f32.mrb[8].mxu1 }
 0x4ff   : > { %v1233_v1 = vmax.f32 %v1225_v15, 0.0  ;;  %v2085_v62 = vpop.f32.mrb[9].mxu1 }
 0x500   : > { %v1228_v16 = vpop.f32.mrb[10].mxu1 }
 0x501   : > { %v1236_v6 = vmul.f32 %v2681_v45, %v1233_v1  ;;  %v2086_v17 = vpop.f32.mrb[11].mxu1 }
 0x503   : > { %1239 = vst.msk [vmem:[#allocation3 + $0x18] sm:$0xff] %vm249_vm0, %v1236_v6 }
 0x50a   : > { %v1268_v4 = vld [vmem:[#allocation3 + $0x18] sm:$0xff] }
 0x50b   : > { %1279 = vrot.lane.b32.xlu1 %v1268_v4, %s2346_s17  ;;  %1254 = vrot.lane.b32.xlu0 %v1268_v4, %s2347_s27  ;;  %1345 = vst.msk [vmem:[#allocation4 + $0x70] sm:$0xff] %vm249_vm0, %v1268_v4 }
 0x50f   : > { %1329 = vrot.lane.b32.xlu1 %v1268_v4, %s2349_s22  ;;  %1304 = vrot.lane.b32.xlu0 %v1268_v4, %s2348_s15 }
 0x513   : > { %1356 = vrot.lane.b32.xlu1 %v1268_v4, %s2350_s23  ;;  %1376 = vrot.lane.b32.xlu0 %v1268_v4, %s2352_s28 }
 0x517   : > { %1396 = vrot.lane.b32.xlu0 %v1268_v4, %s2353_s30  ;;  %1372 = vrot.lane.b32.xlu1 %v2912_v13, %s2352_s28 }
 0x51b   : > { %1250 = vrot.lane.b32.xlu0 %v2912_v13, %s2347_s27  ;;  %1252 = vrot.lane.b32.xlu1 %v2915_v22, %s2347_s27 }
 0x51f   : > { %1275 = vrot.lane.b32.xlu0 %v2912_v13, %s2346_s17  ;;  %1277 = vrot.lane.b32.xlu1 %v2915_v22, %s2346_s17 }
 0x523   : > { %1300 = vrot.lane.b32.xlu0 %v2912_v13, %s2348_s15  ;;  %1302 = vrot.lane.b32.xlu1 %v2915_v22, %s2348_s15 }
 0x527   : > { %1325 = vrot.lane.b32.xlu0 %v2912_v13, %s2349_s22  ;;  %1327 = vrot.lane.b32.xlu1 %v2915_v22, %s2349_s22 }
 0x52b   : > { %1352 = vrot.lane.b32.xlu0 %v2912_v13, %s2350_s23  ;;  %1374 = vrot.lane.b32.xlu1 %v2915_v22, %s2352_s28 }
 0x52f   : > { %1354 = vrot.lane.b32.xlu0 %v2915_v22, %s2350_s23  ;;  %1394 = vrot.lane.b32.xlu1 %v2915_v22, %s2353_s30 }
 0x533   : > { %1392 = vrot.lane.b32.xlu0 %v2912_v13, %s2353_s30  ;;  %1414 = vrot.lane.b32.xlu1 %v2915_v22, %s2354_s3 }
 0x537   : > { %1416 = vrot.lane.b32.xlu0 %v1268_v4, %s2354_s3  ;;  %1412 = vrot.lane.b32.xlu1 %v2912_v13, %s2354_s3 }
 0x53b   : > { %1577 = vrot.lane.b32.xlu0 %v2960_v19, %s2347_s27  ;;  %1602 = vrot.lane.b32.xlu1 %v2960_v19, %s2346_s17 }
 0x53f   : > { %1627 = vrot.lane.b32.xlu0 %v2960_v19, %s2348_s15  ;;  %1652 = vrot.lane.b32.xlu1 %v2960_v19, %s2349_s22 }
 0x57d   : > { %v1280_v24 = vpop.permute.xlu1 %1279  ;;  %v1255_v25 = vpop.permute.xlu0 %1254 }
 0x581   : > { %v1330_v26 = vpop.permute.xlu1 %1329  ;;  %v1305_v27 = vpop.permute.xlu0 %1304 }
 0x585   : > { %v1357_v28 = vpop.permute.xlu1 %1356  ;;  %v1377_v29 = vpop.permute.xlu0 %1376 }
 0x586   : > { %1365 = vst.msk [vmem:[#allocation4 + $0x88] sm:$0xff] %vm249_vm0, %v1357_v28  ;;  %1385 = vst.msk [vmem:[#allocation4 + $0xa0] sm:$0xff] %vm249_vm0, %v1377_v29 }
 0x589   : > { %v1373_v30 = vpop.permute.xlu1 %1372  ;;  %v1397_v31 = vpop.permute.xlu0 %1396 }
 0x58a   : > { %1405 = vst.msk [vmem:[#allocation4 + $0xb8] sm:$0xff] %vm249_vm0, %v1397_v31 }
 0x58d   : > { %v1253_v32 = vpop.permute.xlu1 %1252  ;;  %v1251_v33 = vpop.permute.xlu0 %1250  ;;  %v1443_v17 = vld [vmem:[#allocation4 + $0x88] sm:$0xff] }
 0x58e   : > { %v1258_v34 = vsel %vm267_vm5, %v1253_v32, %v1255_v25  ;;  %v1256_v35 = vsel %vm267_vm5, %v1249_v20, %v1251_v33  ;;  %v1257_v3 = vsel %vm267_vm5, %v1251_v33, %v1253_v32  ;;  %v1446_v32 = vld [vmem:[#allocation4 + $0xa0] sm:$0xff] }
 0x58f   : > { %1264 = vst.msk [vmem:[#allocation4 + $0x10] sm:$0xff] %vm249_vm0, %v1258_v34 }
 0x591   : > { %v1278_v36 = vpop.permute.xlu1 %1277  ;;  %v1276_v38 = vpop.permute.xlu0 %1275 }
 0x592   : > { %v1283_v5 = vsel %vm293_vm4, %v1278_v36, %v1280_v24  ;;  %v1281_v40 = vsel %vm293_vm4, %v1274_v18, %v1276_v38  ;;  %v1282_v42 = vsel %vm293_vm4, %v1276_v38, %v1278_v36  ;;  %v1440_v24 = vld [vmem:[#allocation4 + $0x70] sm:$0xff]  ;;  %v1472_v36 = vld [vmem:[#allocation8 + $0xc] sm:$0xf]  ;;  %v3010_v38 = vld [vmem:[#allocation4 + $0xe8] sm:$0xff] }
 0x593   : > { %1289 = vst.msk [vmem:[#allocation4 + $0x28] sm:$0xff] %vm249_vm0, %v1283_v5  ;;  %v1457_v43 = vpack.c.bf16 %v1282_v42, %v1257_v3  ;;  %v1456_v44 = vpack.c.bf16 %v1281_v40, %v1256_v35  ;;  %v1464_v25 = vpack.c.bf16 %v1443_v17, %v1440_v24 }
 0x595   : > { %v1303_v46 = vpop.permute.xlu1 %1302  ;;  %v1301_v47 = vpop.permute.xlu0 %1300  ;;  %1476 = vmatprep.subr.bf16.mxu0 %v1457_v43 }
 0x596   : > { %v1308_v48 = vsel %vm319_vm6, %v1303_v46, %v1305_v27  ;;  %1477 = vmatpush1.bf16.msra.mxu0 %v1456_v44  ;;  %v1306_v49 = vsel %vm319_vm6, %v1299_v23, %v1301_v47  ;;  %v1307_v54 = vsel %vm319_vm6, %v1301_v47, %v1303_v46  ;;  %v1428_v53 = vld [vmem:[#allocation4 + $0x10] sm:$0xff]  ;;  %v3001_v27 = vld [vmem:[#allocation4 + $0xd8] sm:$0xff] }
 0x597   : > { %1314 = vst.msk [vmem:[#allocation4 + $0x40] sm:$0xff] %vm249_vm0, %v1308_v48 }
 0x599   : > { %v1328_v50 = vpop.permute.xlu1 %1327  ;;  %v1326_v51 = vpop.permute.xlu0 %1325 }
 0x59a   : > { %v1333_v52 = vsel %vm345_vm7, %v1328_v50, %v1330_v26  ;;  %v1331_v55 = vsel %vm345_vm7, %v1324_v21, %v1326_v51  ;;  %v1332_v56 = vsel %vm345_vm7, %v1326_v51, %v1328_v50  ;;  %v1431_v57 = vld [vmem:[#allocation4 + $0x28] sm:$0xff]  ;;  %v2999_v26 = vld [vmem:[#allocation4 + $0xe0] sm:$0xff] }
 0x59b   : > { %1339 = vst.msk [vmem:[#allocation4 + $0x58] sm:$0xff] %vm249_vm0, %v1333_v52  ;;  %v1458_v58 = vpack.c.bf16 %v1431_v57, %v1428_v53  ;;  %v1460_v59 = vpack.c.bf16 %v1332_v56, %v1307_v54  ;;  %v1459_v60 = vpack.c.bf16 %v1331_v55, %v1306_v49 }
 0x59d   : > { %v1375_v63 = vpop.permute.xlu1 %1374  ;;  %2088 = vmatpush3.bf16.msra.mxu1 %v1458_v58  ;;  %v1353_v2 = vpop.permute.xlu0 %1352  ;;  %1478 = vmatprep.subr.bf16.mxu0 %v1460_v59 }
 0x59e   : > { %2089 = vmatprep.subr.bf16.mxu1 %v2960_v19  ;;  %1479 = vmatpush1.bf16.msra.mxu0 %v1459_v60  ;;  %v1434_v14 = vld [vmem:[#allocation4 + $0x40] sm:$0xff]  ;;  %v1379_v6 = vsel %vm394_vm9, %v1375_v63, %v1377_v29  ;;  %v1378_v21 = vsel %vm394_vm9, %v1373_v30, %v1375_v63 }
 0x5a1   : > { %v1395_v10 = vpop.permute.xlu1 %1394  ;;  %v1355_v7 = vpop.permute.xlu0 %1354 }
 0x5a2   : > { %v1399_v9 = vsel %vm415_vm10, %v1395_v10, %v1397_v31  ;;  %v1358_v11 = vsel %vm373_vm8, %v1353_v2, %v1355_v7  ;;  %v1359_v12 = vsel %vm373_vm8, %v1355_v7, %v1357_v28  ;;  %v1437_v15 = vld [vmem:[#allocation4 + $0x58] sm:$0xff] }
 0x5a3   : > { %v1461_v1 = vpack.c.bf16 %v1437_v15, %v1434_v14  ;;  %v1463_v62 = vpack.c.bf16 %v1359_v12, %v2915_v22  ;;  %v1462_v16 = vpack.c.bf16 %v1358_v11, %v2912_v13  ;;  %v1466_v20 = vpack.c.bf16 %v1399_v9, %v1379_v6  ;;  %v1449_v13 = vld [vmem:[#allocation4 + $0xb8] sm:$0xff] }
 0x5a4   : > { %v1467_v33 = vpack.c.bf16 %v1449_v13, %v1446_v32 }
 0x5a5   : > { %v1415_v4 = vpop.permute.xlu1 %1414  ;;  %2090 = vmatpush3.bf16.msra.mxu1 %v1461_v1  ;;  %v1393_v18 = vpop.permute.xlu0 %1392  ;;  %1480 = vmatprep.subr.bf16.mxu0 %v1463_v62 }
 0x5a6   : > { %v1398_v23 = vsel %vm415_vm10, %v1393_v18, %v1395_v10  ;;  %2091 = vmatprep.subr.bf16.mxu1 %v2960_v19  ;;  %1481 = vmatpush1.bf16.msra.mxu0 %v1462_v16 }
 0x5a7   : > { %1482 = vmatprep.subr.bf16.mxu0 %v1466_v20  ;;  %v1465_v22 = vpack.c.bf16 %v1398_v23, %v1378_v21 }
 0x5a9   : > { %v1413_v28 = vpop.permute.xlu1 %1412  ;;  %2092 = vmatpush3.bf16.msra.mxu1 %v1464_v25  ;;  %v1417_v29 = vpop.permute.xlu0 %1416 }
 0x5aa   : > { %v1418_v31 = vsel %vm3195_vm13, %v1413_v28, %v1415_v4  ;;  %v1419_v30 = vsel %vm3196_vm14, %v1415_v4, %v1417_v29  ;;  %1425 = vst.msk [vmem:[#allocation4 + $0xd0] sm:$0xff] %vm249_vm0, %v1417_v29  ;;  %2093 = vmatprep.subr.bf16.mxu1 %v2960_v19  ;;  %1483 = vmatpush1.bf16.msra.mxu0 %v1465_v22 }
 0x5ab   : > { %v1469_v34 = vpack.c.bf16 %v2999_v26, %v1419_v30  ;;  %v1468_v35 = vpack.c.bf16 %v3001_v27, %v1418_v31 }
 0x5ad   : > { %2094 = vmatpush3.bf16.msra.mxu1 %v1467_v33  ;;  %1484 = vmatprep.subr.bf16.mxu0 %v1469_v34 }
 0x5ae   : > { %2095 = vmatprep.subr.bf16.mxu1 %v2960_v19  ;;  %1485 = vmatpush1.bf16.msra.mxu0 %v1468_v35 }
 0x5b1   : > { %v1452_v3 = vld [vmem:[#allocation4 + $0xd0] sm:$0xff]  ;;  %2007 = vmatmul.mubr.msk.bf16.vlgmr.msra.gmra.mrb[12].mxu0 %vm3189_vm1, %v1472_v36 }
 0x5b2   : > { %v1470_v5 = vpack.c.bf16 %v3010_v38, %v1452_v3  ;;  %1840 = vmatprep.mubr.bf16.mxu0 %v2356_v8 }
 0x5b4   : > { %2096 = vmatpush3.bf16.msra.mxu1 %v1470_v5 }
 0x5b5   : > { %2101 = vmatprep.subr.bf16.mxu1 %v2960_v19 }
 0x5b7   : > { %2098 = vmatmul.mubr.msk.bf16.vlgmr.msra.gmra.mrb[12].mxu1 %vm3197_vm12, %v1472_v36 }
 0x5b8   : > { %2111 = vmatprep.mubr.msk.bf16.mxu1 %vm3190_vm3, %v2960_v19 }
 0x684   : > { %v1510_v40 = vpop.f32.mrb[12].mxu0 }
 0x685   : > { %v1560_v42 = vmul.f32 %v2691_v61, %v1510_v40  ;;  %v1512_v43 = vpop.f32.mrb[13].mxu0 }
 0x686   : > { %v1561_v44 = vmul.f32 %v2699_v0, %v1512_v43  ;;  %v1514_v46 = vpop.f32.mrb[14].mxu0  ;;  %v1578_v0 = vpop.permute.xlu0 %1577 }
 0x687   : > { %v3022_v47 = vadd.f32 %v1560_v42, %v2810_v39  ;;  %v1515_v48 = vpop.f32.mrb[15].mxu0 }
 0x688   : > { %v3025_v8 = vadd.f32 %v1561_v44, %v2818_v41 }
 0x68a   : > { %v1551_v49 = vpop.f32.mrb[12].mxu1  ;;  %v1628_v39 = vpop.permute.xlu0 %1627 }
 0x68b   : > { %v1562_v50 = vmul.f32 %v2681_v45, %v1551_v49  ;;  %v2099_v51 = vpop.f32.mrb[13].mxu1  ;;  %v1603_v45 = vpop.permute.xlu1 %1602 }
 0x68c   : > { %v1554_v54 = vpop.f32.mrb[14].mxu1 }
 0x68d   : > { %v1565_v52 = vadd.f32 %v1562_v50, %v2796_v37  ;;  %v2100_v55 = vpop.f32.mrb[15].mxu1 }
 0x68f   : > { %1568 = vst.msk [vmem:[#allocation2 + $0x18] sm:$0xff] %vm249_vm0, %v1565_v52  ;;  %v1653_v37 = vpop.permute.xlu1 %1652 }
 0x696   : > { %v1597_v61 = vld [vmem:[#allocation2 + $0x18] sm:$0xff] }
 0x697   : > { %1608 = vrot.lane.b32.xlu1 %v1597_v61, %s2346_s17  ;;  %1583 = vrot.lane.b32.xlu0 %v1597_v61, %s2347_s27  ;;  %1674 = vst.msk [vmem:[#allocation4 + $0x70] sm:$0xff] %vm249_vm0, %v1597_v61 }
 0x69b   : > { %1658 = vrot.lane.b32.xlu1 %v1597_v61, %s2349_s22  ;;  %1633 = vrot.lane.b32.xlu0 %v1597_v61, %s2348_s15 }
 0x69f   : > { %1685 = vrot.lane.b32.xlu1 %v1597_v61, %s2350_s23  ;;  %1705 = vrot.lane.b32.xlu0 %v1597_v61, %s2352_s28 }
 0x6a3   : > { %1725 = vrot.lane.b32.xlu0 %v1597_v61, %s2353_s30  ;;  %1701 = vrot.lane.b32.xlu1 %v3022_v47, %s2352_s28 }
 0x6a7   : > { %1579 = vrot.lane.b32.xlu0 %v3022_v47, %s2347_s27  ;;  %1581 = vrot.lane.b32.xlu1 %v3025_v8, %s2347_s27 }
 0x6ab   : > { %1604 = vrot.lane.b32.xlu0 %v3022_v47, %s2346_s17  ;;  %1606 = vrot.lane.b32.xlu1 %v3025_v8, %s2346_s17 }
 0x6af   : > { %1629 = vrot.lane.b32.xlu0 %v3022_v47, %s2348_s15  ;;  %1631 = vrot.lane.b32.xlu1 %v3025_v8, %s2348_s15 }
 0x6b3   : > { %1654 = vrot.lane.b32.xlu0 %v3022_v47, %s2349_s22  ;;  %1656 = vrot.lane.b32.xlu1 %v3025_v8, %s2349_s22 }
 0x6b7   : > { %1681 = vrot.lane.b32.xlu0 %v3022_v47, %s2350_s23  ;;  %1703 = vrot.lane.b32.xlu1 %v3025_v8, %s2352_s28 }
 0x6bb   : > { %1683 = vrot.lane.b32.xlu0 %v3025_v8, %s2350_s23  ;;  %1723 = vrot.lane.b32.xlu1 %v3025_v8, %s2353_s30 }
 0x6bf   : > { %1721 = vrot.lane.b32.xlu0 %v3022_v47, %s2353_s30  ;;  %1743 = vrot.lane.b32.xlu1 %v3025_v8, %s2354_s3 }
 0x6c3   : > { %1745 = vrot.lane.b32.xlu0 %v1597_v61, %s2354_s3  ;;  %1741 = vrot.lane.b32.xlu1 %v3022_v47, %s2354_s3 }
 0x709   : > { %v1609_v41 = vpop.permute.xlu1 %1608  ;;  %v1584_v56 = vpop.permute.xlu0 %1583 }
 0x70d   : > { %v1659_v53 = vpop.permute.xlu1 %1658  ;;  %v1634_v57 = vpop.permute.xlu0 %1633 }
 0x711   : > { %v1686_v58 = vpop.permute.xlu1 %1685  ;;  %v1706_v59 = vpop.permute.xlu0 %1705 }
 0x712   : > { %1694 = vst.msk [vmem:[#allocation4 + $0x88] sm:$0xff] %vm249_vm0, %v1686_v58  ;;  %1714 = vst.msk [vmem:[#allocation4 + $0xa0] sm:$0xff] %vm249_vm0, %v1706_v59 }
 0x715   : > { %v1702_v60 = vpop.permute.xlu1 %1701  ;;  %v1726_v63 = vpop.permute.xlu0 %1725 }
 0x716   : > { %1734 = vst.msk [vmem:[#allocation4 + $0xb8] sm:$0xff] %vm249_vm0, %v1726_v63 }
 0x719   : > { %v1582_v2 = vpop.permute.xlu1 %1581  ;;  %v1580_v10 = vpop.permute.xlu0 %1579  ;;  %v1772_v51 = vld [vmem:[#allocation4 + $0x88] sm:$0xff] }
 0x71a   : > { %v1587_v7 = vsel %vm267_vm5, %v1582_v2, %v1584_v56  ;;  %v1585_v9 = vsel %vm267_vm5, %v1578_v0, %v1580_v10  ;;  %v1586_v11 = vsel %vm267_vm5, %v1580_v10, %v1582_v2  ;;  %v1803_v10 = vld [vmem:[%s2515_s29 + $0x10] sm:$0xff] }
 0x71b   : > { %1593 = vst.msk [vmem:[#allocation4 + $0x10] sm:$0xff] %vm249_vm0, %v1587_v7 }
 0x71d   : > { %v1607_v12 = vpop.permute.xlu1 %1606  ;;  %v1605_v14 = vpop.permute.xlu0 %1604 }
 0x71e   : > { %v1612_v15 = vsel %vm293_vm4, %v1607_v12, %v1609_v41  ;;  %v1610_v1 = vsel %vm293_vm4, %v1603_v45, %v1605_v14  ;;  %v1611_v62 = vsel %vm293_vm4, %v1605_v14, %v1607_v12  ;;  %v1769_v45 = vld [vmem:[#allocation4 + $0x70] sm:$0xff]  ;;  %vm3198_vm4 = vmmov %vm3195_vm13  ;;  %v1804_v14 = vld [vmem:[%s2515_s29 + $0x18] sm:$0xff] }
 0x71f   : > { %1618 = vst.msk [vmem:[#allocation4 + $0x28] sm:$0xff] %vm249_vm0, %v1612_v15  ;;  %v1786_v16 = vpack.c.bf16 %v1611_v62, %v1586_v11  ;;  %v1785_v6 = vpack.c.bf16 %v1610_v1, %v1585_v9  ;;  %v1793_v0 = vpack.c.bf16 %v1772_v51, %v1769_v45  ;;  %vm3199_vm5 = vmmov %vm3198_vm4 }
 0x721   : > { %v1632_v17 = vpop.permute.xlu1 %1631  ;;  %v1630_v4 = vpop.permute.xlu0 %1629  ;;  %1808 = vmatprep.subr.bf16.mxu0 %v1786_v16 }
 0x722   : > { %v1637_v18 = vsel %vm319_vm6, %v1632_v17, %v1634_v57  ;;  %v1635_v20 = vsel %vm319_vm6, %v1628_v39, %v1630_v4  ;;  %v1636_v21 = vsel %vm319_vm6, %v1630_v4, %v1632_v17  ;;  %1809 = vmatpush1.bf16.msra.mxu0 %v1785_v6  ;;  %v1757_v28 = vld [vmem:[#allocation4 + $0x10] sm:$0xff]  ;;  %v1778_v39 = vld [vmem:[#allocation4 + $0xb8] sm:$0xff]  ;;  %vm3200_vm6 = vmmov %vm3189_vm1 }
 0x723   : > { %1643 = vst.msk [vmem:[#allocation4 + $0x40] sm:$0xff] %vm249_vm0, %v1637_v18 }
 0x725   : > { %v1657_v23 = vpop.permute.xlu1 %1656  ;;  %v1655_v24 = vpop.permute.xlu0 %1654 }
 0x726   : > { %v1662_v25 = vsel %vm345_vm7, %v1657_v23, %v1659_v53  ;;  %v1660_v22 = vsel %vm345_vm7, %v1653_v37, %v1655_v24  ;;  %v1661_v13 = vsel %vm345_vm7, %v1655_v24, %v1657_v23  ;;  %v1760_v29 = vld [vmem:[#allocation4 + $0x28] sm:$0xff]  ;;  %v1775_v53 = vld [vmem:[#allocation4 + $0xa0] sm:$0xff]  ;;  %vm3201_vm7 = vmmov %vm3189_vm1 }
 0x727   : > { %1668 = vst.msk [vmem:[#allocation4 + $0x58] sm:$0xff] %vm249_vm0, %v1662_v25  ;;  %v1787_v31 = vpack.c.bf16 %v1760_v29, %v1757_v28  ;;  %v1789_v30 = vpack.c.bf16 %v1661_v13, %v1636_v21  ;;  %v1788_v32 = vpack.c.bf16 %v1660_v22, %v1635_v20  ;;  %v1796_v57 = vpack.c.bf16 %v1778_v39, %v1775_v53 }
 0x729   : > { %v1704_v33 = vpop.permute.xlu1 %1703  ;;  %2102 = vmatpush3.bf16.msra.mxu1 %v1787_v31  ;;  %v1682_v34 = vpop.permute.xlu0 %1681  ;;  %1810 = vmatprep.subr.bf16.mxu0 %v1789_v30 }
 0x72a   : > { %v1707_v35 = vsel %vm394_vm9, %v1702_v60, %v1704_v33  ;;  %v1708_v36 = vsel %vm394_vm9, %v1704_v33, %v1706_v59  ;;  %2103 = vmatprep.subr.bf16.mxu1 %v2960_v19  ;;  %1811 = vmatpush1.bf16.msra.mxu0 %v1788_v32  ;;  %v1763_v44 = vld [vmem:[#allocation4 + $0x40] sm:$0xff] }
 0x72b   : > { %v1801_v60 = vld [vmem:[#allocation8 + $0x10] sm:$0xf] }
 0x72d   : > { %v1724_v3 = vpop.permute.xlu1 %1723  ;;  %v1684_v5 = vpop.permute.xlu0 %1683 }
 0x72e   : > { %v1728_v40 = vsel %vm415_vm10, %v1724_v3, %v1726_v63  ;;  %v1687_v42 = vsel %vm373_vm8, %v1682_v34, %v1684_v5  ;;  %v1688_v43 = vsel %vm373_vm8, %v1684_v5, %v1686_v58  ;;  %v1766_v46 = vld [vmem:[#allocation4 + $0x58] sm:$0xff] }
 0x72f   : > { %v1790_v48 = vpack.c.bf16 %v1766_v46, %v1763_v44  ;;  %v1792_v49 = vpack.c.bf16 %v1688_v43, %v3025_v8  ;;  %v1791_v50 = vpack.c.bf16 %v1687_v42, %v3022_v47  ;;  %v1795_v55 = vpack.c.bf16 %v1728_v40, %v1708_v36 }
 0x731   : > { %v1744_v54 = vpop.permute.xlu1 %1743  ;;  %2104 = vmatpush3.bf16.msra.mxu1 %v1790_v48  ;;  %v1722_v52 = vpop.permute.xlu0 %1721  ;;  %1812 = vmatprep.subr.bf16.mxu0 %v1792_v49 }
 0x732   : > { %v1727_v61 = vsel %vm415_vm10, %v1722_v52, %v1724_v3  ;;  %2105 = vmatprep.subr.bf16.mxu1 %v2960_v19  ;;  %1813 = vmatpush1.bf16.msra.mxu0 %v1791_v50 }
 0x733   : > { %1814 = vmatprep.subr.bf16.mxu0 %v1795_v55  ;;  %v1794_v37 = vpack.c.bf16 %v1727_v61, %v1707_v35 }
 0x735   : > { %v1742_v41 = vpop.permute.xlu1 %1741  ;;  %2106 = vmatpush3.bf16.msra.mxu1 %v1793_v0  ;;  %v1746_v8 = vpop.permute.xlu0 %1745 }
 0x736   : > { %v1747_v47 = vsel %vm3198_vm4, %v1742_v41, %v1744_v54  ;;  %v1748_v56 = vsel %vm3199_vm5, %v1744_v54, %v1746_v8  ;;  %1754 = vst.msk [vmem:[#allocation4 + $0xd0] sm:$0xff] %vm249_vm0, %v1746_v8  ;;  %2107 = vmatprep.subr.bf16.mxu1 %v2960_v19  ;;  %1815 = vmatpush1.bf16.msra.mxu0 %v1794_v37 }
 0x737   : > { %v1798_v58 = vpack.c.bf16 %v2999_v26, %v1748_v56  ;;  %v1797_v59 = vpack.c.bf16 %v3001_v27, %v1747_v47  ;;  %v1802_v26 = vld [vmem:[%s2515_s29 + $0x8] sm:$0xff]  ;;  %s2274_s29 = sshll.u32 %s2359_s19, 4  ;;  %s2275_s29 = int_to_ptr.vmem [resolvable:$false] %s2274_s29 }
 0x738   : > { %s2276_s17 = scalar_lea.vmem %s2275_s29, 768  ;;  %p2277_p10 = scmp.lt.s32.totalorder %s3120_s7, %s2275_s29 }
 0x739   : > { %2108 = vmatpush3.bf16.msra.mxu1 %v1796_v57  ;;  %1816 = vmatprep.subr.bf16.mxu0 %v1798_v58  ;;  %p2278_p13 = scmp.lt.s32.totalorder %s2276_s17, %s2270_s26 }
 0x73a   : > { %2109 = vmatprep.subr.bf16.mxu1 %v2960_v19  ;;  %1817 = vmatpush1.bf16.msra.mxu0 %v1797_v59 }
 0x73b   : > { %p2279_p3 = por %p2278_p13, %p2277_p10 }
 0x73d   : > { %v1781_v63 = vld [vmem:[#allocation4 + $0xd0] sm:$0xff]  ;;  %2009 = vmatmul.mubr.msk.bf16.vlgmr.msra.gmra.mrb[16].mxu0 %vm3200_vm6, %v1801_v60  ;;  %p2280_p7 = pnand %p2279_p3, %p2273_p8 }
 0x73e   : > { %v1799_v2 = vpack.c.bf16 %v3010_v38, %v1781_v63 }
 0x740   : > { %2110 = vmatpush3.bf16.msra.mxu1 %v1799_v2 }
 0x743   : > { %2112 = vmatmul.mubr.msk.bf16.vlgmr.msra.gmra.mrb[16].mxu1 %vm3201_vm7, %v1801_v60 }
 0x810   : > { %v1842_v27 = vpop.f32.mrb[16].mxu0 }
 0x811   : > { %v1843_v7 = vadd.f32 %v1842_v27, %v1802_v26  ;;  %v1844_v9 = vpop.f32.mrb[17].mxu0 }
 0x812   : > { %v1845_v11 = vadd.f32 %v1844_v9, %v1803_v10  ;;  %v1846_v19 = vpop.f32.mrb[18].mxu0 }
 0x813   : > { %1889 = vst [vmem:[%s174_s5] sm:$0xff] %v1843_v7  ;;  %v1847_v12 = vpop.f32.mrb[19].mxu0 }
 0x814   : > { %1890 = vst [vmem:[%s174_s5 + $0x8] sm:$0xff] %v1845_v11 }
 0x816   : > { %v1883_v38 = vpop.f32.mrb[16].mxu1 }
 0x817   : > { %v1884_v15 = vadd.f32 %v1883_v38, %v1804_v14  ;;  %v2113_v1 = vpop.f32.mrb[17].mxu1 }
 0x818   : > { %v1886_v62 = vpop.f32.mrb[18].mxu1 }
 0x819   : > { %1891 = vst.msk [vmem:[%s174_s5 + $0x10] sm:$0xff] %vm249_vm0, %v1884_v15  ;;  %v2114_v16 = vpop.f32.mrb[19].mxu1 }
 0x81a   : > { %2283 = shalt.err (!%p2280_p7)
}
 0x81b   : > { %s2284_s20 = scalar_lea.hbm %s3118_s25, 384  ;;  %s2288_s22 = scalar_lea.hbm %s3165_s2, 768 }
 0x81c   : > { %p2285_p9 = scmp.ne.s32.totalorder %s3118_s25, %s2284_s20  ;;  %p2289_p0 = scmp.lt.u32.totalorder %s3118_s25, %s3165_s2 }
 0x81d   : > { %p2290_p11 = scmp.lt.u32.totalorder %s2288_s22, %s2284_s20  ;;  %p2292_p4 = scmp.lt.u32.totalorder %s2284_s20, %s3118_s25 }
 0x81e   : > { %p2286_p2 = pnand %p2285_p9, %p2466_p12 }
 0x81f   : > { %p2291_p1 = por %p2290_p11, %p2289_p0 }
 0x820   : > { %p2287_p5 = pneg %p2286_p2 }
 0x821   : > { %p2293_p6 = por %p2292_p4, %p2291_p1 }
 0x823   : > { %p2294_p8 = pnand %p2293_p6, %p2287_p5 }
 0x825   : > { %2297 = shalt.err (!%p2294_p8)
}
 0x826   : > { %2129 = dma.vmem_to_hbm [thread:$0]  (%p2466_p12), %s3120_s7, 384, %s3118_s25, %s1893_s13  }
 0x827 PF: > { %s1919_s30 = sand.u32 1, %s2328_s9   ;;  %p3202_p10 = scmp.ne.s32.totalorder %s3174_s16, 0 }
 0x828   : > { %p3203_p13 = scmp.ge.s32.totalorder %s2340_s12, 2  ;;  %s1920_s3 = scalar_lea.sflag [#allocation7], %s1919_s30 }
 0x82a   : > { %p2140_p3 = pnand %p3203_p13, %p3202_p10 }
 0x82c   : > { %2323 = dma.done.wait (!%p2140_p3), %s1920_s3, 384  }
 0x82d   : > { %2325 = vsyncadd (!%p2140_p3), %s1920_s3, 4294966912  ;;  %p16_p7 = scmp.ge.s32.totalorder %s2431_s21, 4   ;;  %s3204_s9 = smov %s2332_s10 }
 0x82e   : > { %s3205_s10 = smov %s2336_s11  ;;  %s3206_s11 = smov %s2462_s8 }
 0x82f   : > { %s3207_s12 = smov %s2431_s21  ;;  %18 = sbr.rel (!%p16_p7) target bundleno = 6 (0x6), region = 81 }
 0x836   :  { %1925 = vsyncpa [#allocation6], 1 }
 0x837   :  { %1927 = vsyncpa [#allocation6 + $0x1], 1 }
 0x838   :  { %1928 = vsyncpa [#allocation9], 1 }
 0x839   :  { %1929 = vsyncpa [#allocation7], 1 }
 0x83a   :  { %1931 = vsyncpa [#allocation7 + $0x1], 1 }

</bundles_post_ra>
